<compile_context>
chip_gen: v7x
topology: tpu7x:2x2x1
jax: 0.10.0
libtpu: 0.0.40
codegen_flags: <defaults>
</compile_context>

<pallas_src>
import functools

import jax
import jax.numpy as jnp
from jax import lax
from jax.experimental import pallas as pl
from jax.experimental.pallas import tpu as pltpu


# ----------------------------- in-kernel helpers -----------------------------

def _erf(x):
    # Abramowitz & Stegun 7.1.26 (max abs err ~1.5e-7). Only exp/mul/add,
    # which lower cleanly on the TPU VPU/EUP.
    a1, a2, a3, a4, a5 = 0.254829592, -0.284496736, 1.421413741, -1.453152027, 1.061405429
    p = 0.3275911
    sgn = jnp.where(x >= 0.0, 1.0, -1.0)
    ax = jnp.abs(x)
    t = 1.0 / (1.0 + p * ax)
    poly = ((((a5 * t + a4) * t + a3) * t + a2) * t + a1) * t
    return sgn * (1.0 - poly * jnp.exp(-ax * ax))


def _gelu_exact(x):
    return 0.5 * x * (1.0 + _erf(x * 0.7071067811865476))


# --------------------------------- the kernel --------------------------------

def transformer_kernel(
    x_ref,                               # (B*N, C)
    ln_a_g_ref, ln_a_b_ref,              # (depth, 1, C)  PreNorm (attention branch)
    wq_ref, wk_ref, wv_ref,              # (depth, C, C)  stored as (in, out)
    wp_ref, bp_ref,                      # (depth, C, C), (depth, 1, C)
    ln_t_g_ref, ln_t_b_ref,              # (1, C)         Transformer.norm (shared)
    ln_f_g_ref, ln_f_b_ref,              # (depth, 1, C)  PreNorm (feed-forward branch)
    w1_ref, b1_ref, w2_ref, b2_ref,      # (depth, C, H), (depth, 1, H), (depth, H, C), (depth, 1, C)
    o_ref,                               # (B*N, C)
    *, B, N, num_heads, depth, scale,
):
    BN, C = x_ref.shape
    hd = C // num_heads
    eps = 1e-5

    # ---- constants, hoisted out of the depth / batch loops ----
    row = lax.broadcasted_iota(jnp.int32, (BN, 1), 0)              # flattened row id
    # Head-membership one-hot matrices (comparisons only, no integer division).
    c_i = lax.broadcasted_iota(jnp.int32, (C, num_heads), 0)
    h_i = lax.broadcasted_iota(jnp.int32, (C, num_heads), 1)
    head_sel_T = ((c_i >= h_i * hd) & (c_i < (h_i + 1) * hd)).astype(jnp.float32)   # (C, H)
    h_j = lax.broadcasted_iota(jnp.int32, (num_heads, C), 0)
    c_j = lax.broadcasted_iota(jnp.int32, (num_heads, C), 1)
    head_sel = ((c_j >= h_j * hd) & (c_j < (h_j + 1) * hd)).astype(jnp.float32)     # (H, C)

    ln_t_g = ln_t_g_ref[...]
    ln_t_b = ln_t_b_ref[...]
    x = x_ref[...]                                                  # (BN, C), f32

    for d in range(depth):                                          # static unroll (depth small)
        ln_a_g = ln_a_g_ref[d]; ln_a_b = ln_a_b_ref[d]
        wq = wq_ref[d]; wk = wk_ref[d]; wv = wv_ref[d]
        wp = wp_ref[d]; bp = bp_ref[d]
        ln_f_g = ln_f_g_ref[d]; ln_f_b = ln_f_b_ref[d]
        w1 = w1_ref[d]; b1 = b1_ref[d]
        w2 = w2_ref[d]; b2 = b2_ref[d]

        # ---- shared LayerNorm statistics for ln_a and Transformer.norm ----
        mu = jnp.mean(x, axis=-1, keepdims=True)
        xc = x - mu
        var = jnp.mean(xc * xc, axis=-1, keepdims=True)
        xn = xc * lax.rsqrt(var + eps)                              # normalized x (BN, C)
        y = xn * ln_a_g + ln_a_b                                    # PreNorm (attention branch)
        ln_t_all = xn * ln_t_g + ln_t_b                             # Transformer.norm (rows != 0 used)

        # ---- k / v for all rows (batch folded into the row dimension) ----
        k = jnp.dot(y, wk, preferred_element_type=jnp.float32)      # (BN, C)
        v = jnp.dot(y, wv, preferred_element_type=jnp.float32)      # (BN, C)

        x_new = ln_t_all
        for b in range(B):                                          # static unroll (B small)
            r0 = b * N
            y0 = y[r0:r0 + 1, :]                                    # (1, C) query token
            q = jnp.dot(y0, wq, preferred_element_type=jnp.float32) # (1, C) -- q only for row 0
            k_b = k[r0:r0 + N, :]                                   # (N, C)
            v_b = v[r0:r0 + N, :]                                   # (N, C)

            # Per-head scores in one MXU matmul: s[n, h] = <q_h, k_h[n]> * scale
            s = jnp.dot(k_b * q, head_sel_T,
                        preferred_element_type=jnp.float32) * scale  # (N, H)
            s = s - jnp.max(s, axis=0, keepdims=True)
            e = jnp.exp(s)
            p = e * pl.reciprocal(jnp.sum(e, axis=0, keepdims=True), approx=True)
            # Expand (N, H) -> (N, C) attention weights, reduce against v.
            p_full = jnp.dot(p, head_sel, preferred_element_type=jnp.float32)      # (N, C)
            attn_v = jnp.sum(p_full * v_b, axis=0, keepdims=True)                  # (1, C)
            a = jnp.dot(attn_v, wp, preferred_element_type=jnp.float32) + bp       # (1, C)

            # CrossAttentionBlock: y[:,0:1] + attn(y); concat with Transformer.norm(x[:,1:])
            # is a row-select into the flattened slab.
            x_new = jnp.where(row == r0, y0 + a, x_new)

        # ---- PreNorm + FeedForward + residual ----
        mu2 = jnp.mean(x_new, axis=-1, keepdims=True)
        zc = x_new - mu2
        var2 = jnp.mean(zc * zc, axis=-1, keepdims=True)
        z = zc * lax.rsqrt(var2 + eps) * ln_f_g + ln_f_b
        h1 = _gelu_exact(jnp.dot(z, w1, preferred_element_type=jnp.float32) + b1)
        x = jnp.dot(h1, w2, preferred_element_type=jnp.float32) + b2 + x_new

    o_ref[...] = x.astype(o_ref.dtype)


# --------------------------------- wrappers ----------------------------------

def transformer_pallas(x, layer_params, ln_t_g, ln_t_b, num_heads):
    B, N, C = x.shape
    depth = len(layer_params)
    scale = (C // num_heads) ** -0.5

    stack = lambda key: jnp.stack([p[key] for p in layer_params], axis=0)
    args = (
        x.reshape(B * N, C),
        stack("ln_a_g"), stack("ln_a_b"),
        stack("wq"), stack("wk"), stack("wv"),
        stack("wp"), stack("bp"),
        ln_t_g, ln_t_b,
        stack("ln_f_g"), stack("ln_f_b"),
        stack("w1"), stack("b1"), stack("w2"), stack("b2"),
    )

    kernel = functools.partial(
        transformer_kernel, B=B, N=N, num_heads=num_heads, depth=depth, scale=scale)

    vmem_spec = pl.BlockSpec(memory_space=pltpu.MemorySpace.VMEM)
    out = pl.pallas_call(
        kernel,
        out_shape=jax.ShapeDtypeStruct((B * N, C), jnp.float32),
        in_specs=[vmem_spec] * len(args),
        out_specs=vmem_spec,
    )(*args)
    return out.reshape(B, N, C)


def transformer_ref(x, layer_params, ln_t_g, ln_t_b, num_heads):
    """Pure-JAX reference mirroring the PyTorch forward (eval mode)."""
    def ln(t, g, b, eps=1e-5):
        mu = t.mean(-1, keepdims=True)
        var = ((t - mu) ** 2).mean(-1, keepdims=True)
        return (t - mu) / jnp.sqrt(var + eps) * g + b

    B, N, C = x.shape
    hd = C // num_heads
    scale = hd ** -0.5
    for p in layer_params:
        y = ln(x, p["ln_a_g"][0], p["ln_a_b"][0])
        q = y[:, 0:1, :] @ p["wq"]
        k = y @ p["wk"]
        v = y @ p["wv"]
        qh = q.reshape(B, 1, num_heads, hd).transpose(0, 2, 1, 3)
        kh = k.reshape(B, N, num_heads, hd).transpose(0, 2, 1, 3)
        vh = v.reshape(B, N, num_heads, hd).transpose(0, 2, 1, 3)
        attn = jnp.einsum("bhqd,bhkd->bhqk", qh, kh) * scale
        attn = jax.nn.softmax(attn, axis=-1)
        o = jnp.einsum("bhqk,bhkd->bhqd", attn, vh).transpose(0, 2, 1, 3).reshape(B, 1, C)
        o = o @ p["wp"] + p["bp"][0]
        attn_out = y[:, 0:1, :] + o
        rest = ln(x[:, 1:, :], ln_t_g[0], ln_t_b[0])
        x = jnp.concatenate([attn_out, rest], axis=1)
        z = ln(x, p["ln_f_g"][0], p["ln_f_b"][0])
        h1 = jax.nn.gelu(z @ p["w1"] + p["b1"][0], approximate=False)
        x = (h1 @ p["w2"] + p["b2"][0]) + x
    return x


def make_layer_params(key, dim, mlp_dim):
    ks = jax.random.split(key, 12)
    w = lambda k, shape, s=0.02: jax.random.normal(k, shape, jnp.float32) * s
    return dict(
        ln_a_g=1.0 + w(ks[0], (1, dim)), ln_a_b=w(ks[1], (1, dim)),
        wq=w(ks[2], (dim, dim)), wk=w(ks[3], (dim, dim)), wv=w(ks[4], (dim, dim)),
        wp=w(ks[5], (dim, dim)), bp=w(ks[6], (1, dim)),
        ln_f_g=1.0 + w(ks[7], (1, dim)), ln_f_b=w(ks[8], (1, dim)),
        w1=w(ks[9], (dim, mlp_dim)), b1=w(ks[10], (1, mlp_dim)),
        w2=w(ks[11], (mlp_dim, dim)), b2=jnp.zeros((1, dim), jnp.float32),
    )


if __name__ == "__main__":
    # Transformer(dim=32, depth=2, heads=4, dim_head=8, mlp_dim=64, dropout=0.0)
    B, N, dim = 2, 8, 32
    depth, heads, mlp_dim = 2, 4, 64

    key = jax.random.PRNGKey(0)
    k_x, k_norm_g, k_norm_b, *k_layers = jax.random.split(key, 3 + depth)

    x = jax.random.normal(k_x, (B, N, dim), jnp.float32)
    ln_t_g = 1.0 + 0.02 * jax.random.normal(k_norm_g, (1, dim), jnp.float32)
    ln_t_b = 0.02 * jax.random.normal(k_norm_b, (1, dim), jnp.float32)
    layer_params = [make_layer_params(k, dim, mlp_dim) for k in k_layers]

    out = transformer_pallas(x, layer_params, ln_t_g, ln_t_b, heads)
    out = jax.block_until_ready(out)

    ref = transformer_ref(x, layer_params, ln_t_g, ln_t_b, heads)
    assert out.shape == (B, N, dim), out.shape
    # Loose tolerance: erf polynomial approximation, MXU f32 accumulation and
    # the approximate EUP reciprocal in the softmax differ slightly from XLA.
    if not jnp.allclose(out, ref, atol=2e-2, rtol=2e-2):
        raise AssertionError(
            f"mismatch: max abs diff {float(jnp.max(jnp.abs(out - ref)))}")

    print("KERNEL_OK")
</pallas_src>

<mosaic_0001>
module attributes {stable_mosaic.version = 11 : i64} {
  func.func @transformer_kernel(%arg0: memref<16x32xf32, #tpu.memory_space<vmem>>, %arg1: memref<2x1x32xf32, #tpu.memory_space<vmem>>, %arg2: memref<2x1x32xf32, #tpu.memory_space<vmem>>, %arg3: memref<2x32x32xf32, #tpu.memory_space<vmem>>, %arg4: memref<2x32x32xf32, #tpu.memory_space<vmem>>, %arg5: memref<2x32x32xf32, #tpu.memory_space<vmem>>, %arg6: memref<2x32x32xf32, #tpu.memory_space<vmem>>, %arg7: memref<2x1x32xf32, #tpu.memory_space<vmem>>, %arg8: memref<1x32xf32, #tpu.memory_space<vmem>>, %arg9: memref<1x32xf32, #tpu.memory_space<vmem>>, %arg10: memref<2x1x32xf32, #tpu.memory_space<vmem>>, %arg11: memref<2x1x32xf32, #tpu.memory_space<vmem>>, %arg12: memref<2x32x64xf32, #tpu.memory_space<vmem>>, %arg13: memref<2x1x64xf32, #tpu.memory_space<vmem>>, %arg14: memref<2x64x32xf32, #tpu.memory_space<vmem>>, %arg15: memref<2x1x32xf32, #tpu.memory_space<vmem>>, %arg16: memref<16x32xf32, #tpu.memory_space<vmem>>) attributes {dimension_semantics = [], scalar_prefetch = 0 : i64, scratch_operands = 0 : i64, tpu.core_type = #tpu.core_type<tc>} {
    %0 = tpu.iota {dimensions = array<i32: 0>} : vector<16x1xi32>
    %1 = tpu.iota {dimensions = array<i32: 0>} : vector<32x4xi32>
    %2 = tpu.iota {dimensions = array<i32: 1>} : vector<32x4xi32>
    %c8_i32 = arith.constant 8 : i32
    %3 = vector.broadcast %c8_i32 : i32 to vector<32x4xi32>
    %4 = arith.muli %2, %3 : vector<32x4xi32>
    %5 = arith.cmpi sge, %1, %4 : vector<32x4xi32>
    %c1_i32 = arith.constant 1 : i32
    %6 = vector.broadcast %c1_i32 : i32 to vector<32x4xi32>
    %7 = arith.addi %2, %6 : vector<32x4xi32>
    %c8_i32_0 = arith.constant 8 : i32
    %8 = vector.broadcast %c8_i32_0 : i32 to vector<32x4xi32>
    %9 = arith.muli %7, %8 : vector<32x4xi32>
    %10 = arith.cmpi slt, %1, %9 : vector<32x4xi32>
    %11 = arith.andi %5, %10 : vector<32x4xi1>
    %12 = arith.extui %11 : vector<32x4xi1> to vector<32x4xi32>
    %13 = arith.sitofp %12 : vector<32x4xi32> to vector<32x4xf32>
    %14 = tpu.iota {dimensions = array<i32: 0>} : vector<4x32xi32>
    %15 = tpu.iota {dimensions = array<i32: 1>} : vector<4x32xi32>
    %c8_i32_1 = arith.constant 8 : i32
    %16 = vector.broadcast %c8_i32_1 : i32 to vector<4x32xi32>
    %17 = arith.muli %14, %16 : vector<4x32xi32>
    %18 = arith.cmpi sge, %15, %17 : vector<4x32xi32>
    %c1_i32_2 = arith.constant 1 : i32
    %19 = vector.broadcast %c1_i32_2 : i32 to vector<4x32xi32>
    %20 = arith.addi %14, %19 : vector<4x32xi32>
    %c8_i32_3 = arith.constant 8 : i32
    %21 = vector.broadcast %c8_i32_3 : i32 to vector<4x32xi32>
    %22 = arith.muli %20, %21 : vector<4x32xi32>
    %23 = arith.cmpi slt, %15, %22 : vector<4x32xi32>
    %24 = arith.andi %18, %23 : vector<4x32xi1>
    %25 = arith.extui %24 : vector<4x32xi1> to vector<4x32xi32>
    %26 = arith.sitofp %25 : vector<4x32xi32> to vector<4x32xf32>
    %c0 = arith.constant 0 : index
    %c0_4 = arith.constant 0 : index
    %27 = vector.load %arg8[%c0, %c0_4] : memref<1x32xf32, #tpu.memory_space<vmem>>, vector<1x32xf32>
    %c0_5 = arith.constant 0 : index
    %c0_6 = arith.constant 0 : index
    %28 = vector.load %arg9[%c0_5, %c0_6] : memref<1x32xf32, #tpu.memory_space<vmem>>, vector<1x32xf32>
    %c0_7 = arith.constant 0 : index
    %c0_8 = arith.constant 0 : index
    %29 = vector.load %arg0[%c0_7, %c0_8] : memref<16x32xf32, #tpu.memory_space<vmem>>, vector<16x32xf32>
    %c0_9 = arith.constant 0 : index
    %c0_10 = arith.constant 0 : index
    %c0_11 = arith.constant 0 : index
    %30 = vector.load %arg1[%c0_9, %c0_10, %c0_11] : memref<2x1x32xf32, #tpu.memory_space<vmem>>, vector<1x1x32xf32>
    %31 = vector.shape_cast %30 : vector<1x1x32xf32> to vector<1x32xf32>
    %c0_12 = arith.constant 0 : index
    %c0_13 = arith.constant 0 : index
    %c0_14 = arith.constant 0 : index
    %32 = vector.load %arg2[%c0_12, %c0_13, %c0_14] : memref<2x1x32xf32, #tpu.memory_space<vmem>>, vector<1x1x32xf32>
    %33 = vector.shape_cast %32 : vector<1x1x32xf32> to vector<1x32xf32>
    %c0_15 = arith.constant 0 : index
    %c0_16 = arith.constant 0 : index
    %c0_17 = arith.constant 0 : index
    %34 = vector.load %arg3[%c0_15, %c0_16, %c0_17] : memref<2x32x32xf32, #tpu.memory_space<vmem>>, vector<1x32x32xf32>
    %35 = vector.shape_cast %34 : vector<1x32x32xf32> to vector<32x32xf32>
    %c0_18 = arith.constant 0 : index
    %c0_19 = arith.constant 0 : index
    %c0_20 = arith.constant 0 : index
    %36 = vector.load %arg4[%c0_18, %c0_19, %c0_20] : memref<2x32x32xf32, #tpu.memory_space<vmem>>, vector<1x32x32xf32>
    %37 = vector.shape_cast %36 : vector<1x32x32xf32> to vector<32x32xf32>
    %c0_21 = arith.constant 0 : index
    %c0_22 = arith.constant 0 : index
    %c0_23 = arith.constant 0 : index
    %38 = vector.load %arg5[%c0_21, %c0_22, %c0_23] : memref<2x32x32xf32, #tpu.memory_space<vmem>>, vector<1x32x32xf32>
    %39 = vector.shape_cast %38 : vector<1x32x32xf32> to vector<32x32xf32>
    %c0_24 = arith.constant 0 : index
    %c0_25 = arith.constant 0 : index
    %c0_26 = arith.constant 0 : index
    %40 = vector.load %arg6[%c0_24, %c0_25, %c0_26] : memref<2x32x32xf32, #tpu.memory_space<vmem>>, vector<1x32x32xf32>
    %41 = vector.shape_cast %40 : vector<1x32x32xf32> to vector<32x32xf32>
    %c0_27 = arith.constant 0 : index
    %c0_28 = arith.constant 0 : index
    %c0_29 = arith.constant 0 : index
    %42 = vector.load %arg7[%c0_27, %c0_28, %c0_29] : memref<2x1x32xf32, #tpu.memory_space<vmem>>, vector<1x1x32xf32>
    %43 = vector.shape_cast %42 : vector<1x1x32xf32> to vector<1x32xf32>
    %c0_30 = arith.constant 0 : index
    %c0_31 = arith.constant 0 : index
    %c0_32 = arith.constant 0 : index
    %44 = vector.load %arg10[%c0_30, %c0_31, %c0_32] : memref<2x1x32xf32, #tpu.memory_space<vmem>>, vector<1x1x32xf32>
    %45 = vector.shape_cast %44 : vector<1x1x32xf32> to vector<1x32xf32>
    %c0_33 = arith.constant 0 : index
    %c0_34 = arith.constant 0 : index
    %c0_35 = arith.constant 0 : index
    %46 = vector.load %arg11[%c0_33, %c0_34, %c0_35] : memref<2x1x32xf32, #tpu.memory_space<vmem>>, vector<1x1x32xf32>
    %47 = vector.shape_cast %46 : vector<1x1x32xf32> to vector<1x32xf32>
    %c0_36 = arith.constant 0 : index
    %c0_37 = arith.constant 0 : index
    %c0_38 = arith.constant 0 : index
    %48 = vector.load %arg12[%c0_36, %c0_37, %c0_38] : memref<2x32x64xf32, #tpu.memory_space<vmem>>, vector<1x32x64xf32>
    %49 = vector.shape_cast %48 : vector<1x32x64xf32> to vector<32x64xf32>
    %c0_39 = arith.constant 0 : index
    %c0_40 = arith.constant 0 : index
    %c0_41 = arith.constant 0 : index
    %50 = vector.load %arg13[%c0_39, %c0_40, %c0_41] : memref<2x1x64xf32, #tpu.memory_space<vmem>>, vector<1x1x64xf32>
    %51 = vector.shape_cast %50 : vector<1x1x64xf32> to vector<1x64xf32>
    %c0_42 = arith.constant 0 : index
    %c0_43 = arith.constant 0 : index
    %c0_44 = arith.constant 0 : index
    %52 = vector.load %arg14[%c0_42, %c0_43, %c0_44] : memref<2x64x32xf32, #tpu.memory_space<vmem>>, vector<1x64x32xf32>
    %53 = vector.shape_cast %52 : vector<1x64x32xf32> to vector<64x32xf32>
    %c0_45 = arith.constant 0 : index
    %c0_46 = arith.constant 0 : index
    %c0_47 = arith.constant 0 : index
    %54 = vector.load %arg15[%c0_45, %c0_46, %c0_47] : memref<2x1x32xf32, #tpu.memory_space<vmem>>, vector<1x1x32xf32>
    %55 = vector.shape_cast %54 : vector<1x1x32xf32> to vector<1x32xf32>
    %cst = arith.constant dense<0.000000e+00> : vector<16xf32>
    %56 = vector.multi_reduction <add>, %29, %cst [1] : vector<16x32xf32> to vector<16xf32>
    %57 = vector.shape_cast %56 : vector<16xf32> to vector<16x1xf32>
    %cst_48 = arith.constant 3.200000e+01 : f32
    %58 = vector.broadcast %cst_48 : f32 to vector<16x1xf32>
    %59 = arith.divf %57, %58 : vector<16x1xf32>
    %60 = vector.broadcast %59 : vector<16x1xf32> to vector<16x32xf32>
    %61 = arith.subf %29, %60 : vector<16x32xf32>
    %62 = arith.mulf %61, %61 : vector<16x32xf32>
    %cst_49 = arith.constant dense<0.000000e+00> : vector<16xf32>
    %63 = vector.multi_reduction <add>, %62, %cst_49 [1] : vector<16x32xf32> to vector<16xf32>
    %64 = vector.shape_cast %63 : vector<16xf32> to vector<16x1xf32>
    %cst_50 = arith.constant 3.200000e+01 : f32
    %65 = vector.broadcast %cst_50 : f32 to vector<16x1xf32>
    %66 = arith.divf %64, %65 : vector<16x1xf32>
    %cst_51 = arith.constant 9.99999974E-6 : f32
    %67 = vector.broadcast %cst_51 : f32 to vector<16x1xf32>
    %68 = arith.addf %66, %67 : vector<16x1xf32>
    %69 = math.rsqrt %68 : vector<16x1xf32>
    %70 = vector.broadcast %69 : vector<16x1xf32> to vector<16x32xf32>
    %71 = arith.mulf %61, %70 : vector<16x32xf32>
    %72 = vector.broadcast %31 : vector<1x32xf32> to vector<16x32xf32>
    %73 = arith.mulf %71, %72 : vector<16x32xf32>
    %74 = vector.broadcast %33 : vector<1x32xf32> to vector<16x32xf32>
    %75 = arith.addf %73, %74 : vector<16x32xf32>
    %76 = vector.broadcast %27 : vector<1x32xf32> to vector<16x32xf32>
    %77 = arith.mulf %71, %76 : vector<16x32xf32>
    %78 = vector.broadcast %28 : vector<1x32xf32> to vector<16x32xf32>
    %79 = arith.addf %77, %78 : vector<16x32xf32>
    %cst_52 = arith.constant dense<0.000000e+00> : vector<16x32xf32>
    %80 = tpu.matmul %75, %37, %cst_52 {dimension_numbers = #tpu.dot_dimension_numbers<[1], [0], [0], [1], [0, 0, 1, 1], [], []>} : vector<16x32xf32>, vector<32x32xf32>, vector<16x32xf32> -> vector<16x32xf32>
    %cst_53 = arith.constant dense<0.000000e+00> : vector<16x32xf32>
    %81 = tpu.matmul %75, %39, %cst_53 {dimension_numbers = #tpu.dot_dimension_numbers<[1], [0], [0], [1], [0, 0, 1, 1], [], []>} : vector<16x32xf32>, vector<32x32xf32>, vector<16x32xf32> -> vector<16x32xf32>
    %82 = vector.extract_strided_slice %75 {offsets = [0, 0], sizes = [1, 32], strides = [1, 1]} : vector<16x32xf32> to vector<1x32xf32>
    %cst_54 = arith.constant dense<0.000000e+00> : vector<1x32xf32>
    %83 = tpu.matmul %82, %35, %cst_54 {dimension_numbers = #tpu.dot_dimension_numbers<[1], [0], [0], [1], [0, 0, 1, 1], [], []>} : vector<1x32xf32>, vector<32x32xf32>, vector<1x32xf32> -> vector<1x32xf32>
    %84 = vector.extract_strided_slice %80 {offsets = [0, 0], sizes = [8, 32], strides = [1, 1]} : vector<16x32xf32> to vector<8x32xf32>
    %85 = vector.extract_strided_slice %81 {offsets = [0, 0], sizes = [8, 32], strides = [1, 1]} : vector<16x32xf32> to vector<8x32xf32>
    %86 = vector.broadcast %83 : vector<1x32xf32> to vector<8x32xf32>
    %87 = arith.mulf %84, %86 : vector<8x32xf32>
    %cst_55 = arith.constant dense<0.000000e+00> : vector<8x4xf32>
    %88 = tpu.matmul %87, %13, %cst_55 {dimension_numbers = #tpu.dot_dimension_numbers<[1], [0], [0], [1], [0, 0, 1, 1], [], []>} : vector<8x32xf32>, vector<32x4xf32>, vector<8x4xf32> -> vector<8x4xf32>
    %cst_56 = arith.constant 0.353553385 : f32
    %89 = vector.broadcast %cst_56 : f32 to vector<8x4xf32>
    %90 = arith.mulf %88, %89 : vector<8x4xf32>
    %cst_57 = arith.constant dense<0xFF800000> : vector<4xf32>
    %91 = vector.multi_reduction <maximumf>, %90, %cst_57 [0] : vector<8x4xf32> to vector<4xf32>
    %92 = vector.shape_cast %91 : vector<4xf32> to vector<1x4xf32>
    %93 = vector.broadcast %92 : vector<1x4xf32> to vector<8x4xf32>
    %94 = arith.subf %90, %93 : vector<8x4xf32>
    %95 = math.exp %94 : vector<8x4xf32>
    %cst_58 = arith.constant dense<0.000000e+00> : vector<4xf32>
    %96 = vector.multi_reduction <add>, %95, %cst_58 [0] : vector<8x4xf32> to vector<4xf32>
    %97 = vector.shape_cast %96 : vector<4xf32> to vector<1x4xf32>
    %98 = tpu.reciprocal %97 {approx = true} : vector<1x4xf32> -> vector<1x4xf32>
    %99 = vector.broadcast %98 : vector<1x4xf32> to vector<8x4xf32>
    %100 = arith.mulf %95, %99 : vector<8x4xf32>
    %cst_59 = arith.constant dense<0.000000e+00> : vector<8x32xf32>
    %101 = tpu.matmul %100, %26, %cst_59 {dimension_numbers = #tpu.dot_dimension_numbers<[1], [0], [0], [1], [0, 0, 1, 1], [], []>} : vector<8x4xf32>, vector<4x32xf32>, vector<8x32xf32> -> vector<8x32xf32>
    %102 = arith.mulf %101, %85 : vector<8x32xf32>
    %cst_60 = arith.constant dense<0.000000e+00> : vector<32xf32>
    %103 = vector.multi_reduction <add>, %102, %cst_60 [0] : vector<8x32xf32> to vector<32xf32>
    %104 = vector.shape_cast %103 : vector<32xf32> to vector<1x32xf32>
    %cst_61 = arith.constant dense<0.000000e+00> : vector<1x32xf32>
    %105 = tpu.matmul %104, %41, %cst_61 {dimension_numbers = #tpu.dot_dimension_numbers<[1], [0], [0], [1], [0, 0, 1, 1], [], []>} : vector<1x32xf32>, vector<32x32xf32>, vector<1x32xf32> -> vector<1x32xf32>
    %106 = arith.addf %105, %43 : vector<1x32xf32>
    %c0_i32 = arith.constant 0 : i32
    %107 = vector.broadcast %c0_i32 : i32 to vector<16x1xi32>
    %108 = arith.cmpi eq, %0, %107 : vector<16x1xi32>
    %109 = arith.addf %82, %106 : vector<1x32xf32>
    %110 = vector.shape_cast %108 : vector<16x1xi1> to vector<16x1xi1>
    %111 = vector.broadcast %110 : vector<16x1xi1> to vector<16x32xi1>
    %112 = vector.shape_cast %109 : vector<1x32xf32> to vector<1x32xf32>
    %113 = vector.broadcast %112 : vector<1x32xf32> to vector<16x32xf32>
    %114 = arith.select %111, %113, %79 : vector<16x32xi1>, vector<16x32xf32>
    %115 = vector.extract_strided_slice %75 {offsets = [8, 0], sizes = [1, 32], strides = [1, 1]} : vector<16x32xf32> to vector<1x32xf32>
    %cst_62 = arith.constant dense<0.000000e+00> : vector<1x32xf32>
    %116 = tpu.matmul %115, %35, %cst_62 {dimension_numbers = #tpu.dot_dimension_numbers<[1], [0], [0], [1], [0, 0, 1, 1], [], []>} : vector<1x32xf32>, vector<32x32xf32>, vector<1x32xf32> -> vector<1x32xf32>
    %117 = vector.extract_strided_slice %80 {offsets = [8, 0], sizes = [8, 32], strides = [1, 1]} : vector<16x32xf32> to vector<8x32xf32>
    %118 = vector.extract_strided_slice %81 {offsets = [8, 0], sizes = [8, 32], strides = [1, 1]} : vector<16x32xf32> to vector<8x32xf32>
    %119 = vector.broadcast %116 : vector<1x32xf32> to vector<8x32xf32>
    %120 = arith.mulf %117, %119 : vector<8x32xf32>
    %cst_63 = arith.constant dense<0.000000e+00> : vector<8x4xf32>
    %121 = tpu.matmul %120, %13, %cst_63 {dimension_numbers = #tpu.dot_dimension_numbers<[1], [0], [0], [1], [0, 0, 1, 1], [], []>} : vector<8x32xf32>, vector<32x4xf32>, vector<8x4xf32> -> vector<8x4xf32>
    %cst_64 = arith.constant 0.353553385 : f32
    %122 = vector.broadcast %cst_64 : f32 to vector<8x4xf32>
    %123 = arith.mulf %121, %122 : vector<8x4xf32>
    %cst_65 = arith.constant dense<0xFF800000> : vector<4xf32>
    %124 = vector.multi_reduction <maximumf>, %123, %cst_65 [0] : vector<8x4xf32> to vector<4xf32>
    %125 = vector.shape_cast %124 : vector<4xf32> to vector<1x4xf32>
    %126 = vector.broadcast %125 : vector<1x4xf32> to vector<8x4xf32>
    %127 = arith.subf %123, %126 : vector<8x4xf32>
    %128 = math.exp %127 : vector<8x4xf32>
    %cst_66 = arith.constant dense<0.000000e+00> : vector<4xf32>
    %129 = vector.multi_reduction <add>, %128, %cst_66 [0] : vector<8x4xf32> to vector<4xf32>
    %130 = vector.shape_cast %129 : vector<4xf32> to vector<1x4xf32>
    %131 = tpu.reciprocal %130 {approx = true} : vector<1x4xf32> -> vector<1x4xf32>
    %132 = vector.broadcast %131 : vector<1x4xf32> to vector<8x4xf32>
    %133 = arith.mulf %128, %132 : vector<8x4xf32>
    %cst_67 = arith.constant dense<0.000000e+00> : vector<8x32xf32>
    %134 = tpu.matmul %133, %26, %cst_67 {dimension_numbers = #tpu.dot_dimension_numbers<[1], [0], [0], [1], [0, 0, 1, 1], [], []>} : vector<8x4xf32>, vector<4x32xf32>, vector<8x32xf32> -> vector<8x32xf32>
    %135 = arith.mulf %134, %118 : vector<8x32xf32>
    %cst_68 = arith.constant dense<0.000000e+00> : vector<32xf32>
    %136 = vector.multi_reduction <add>, %135, %cst_68 [0] : vector<8x32xf32> to vector<32xf32>
    %137 = vector.shape_cast %136 : vector<32xf32> to vector<1x32xf32>
    %cst_69 = arith.constant dense<0.000000e+00> : vector<1x32xf32>
    %138 = tpu.matmul %137, %41, %cst_69 {dimension_numbers = #tpu.dot_dimension_numbers<[1], [0], [0], [1], [0, 0, 1, 1], [], []>} : vector<1x32xf32>, vector<32x32xf32>, vector<1x32xf32> -> vector<1x32xf32>
    %139 = arith.addf %138, %43 : vector<1x32xf32>
    %c8_i32_70 = arith.constant 8 : i32
    %140 = vector.broadcast %c8_i32_70 : i32 to vector<16x1xi32>
    %141 = arith.cmpi eq, %0, %140 : vector<16x1xi32>
    %142 = arith.addf %115, %139 : vector<1x32xf32>
    %143 = vector.shape_cast %141 : vector<16x1xi1> to vector<16x1xi1>
    %144 = vector.broadcast %143 : vector<16x1xi1> to vector<16x32xi1>
    %145 = vector.shape_cast %142 : vector<1x32xf32> to vector<1x32xf32>
    %146 = vector.broadcast %145 : vector<1x32xf32> to vector<16x32xf32>
    %147 = arith.select %144, %146, %114 : vector<16x32xi1>, vector<16x32xf32>
    %cst_71 = arith.constant dense<0.000000e+00> : vector<16xf32>
    %148 = vector.multi_reduction <add>, %147, %cst_71 [1] : vector<16x32xf32> to vector<16xf32>
    %149 = vector.shape_cast %148 : vector<16xf32> to vector<16x1xf32>
    %cst_72 = arith.constant 3.200000e+01 : f32
    %150 = vector.broadcast %cst_72 : f32 to vector<16x1xf32>
    %151 = arith.divf %149, %150 : vector<16x1xf32>
    %152 = vector.broadcast %151 : vector<16x1xf32> to vector<16x32xf32>
    %153 = arith.subf %147, %152 : vector<16x32xf32>
    %154 = arith.mulf %153, %153 : vector<16x32xf32>
    %cst_73 = arith.constant dense<0.000000e+00> : vector<16xf32>
    %155 = vector.multi_reduction <add>, %154, %cst_73 [1] : vector<16x32xf32> to vector<16xf32>
    %156 = vector.shape_cast %155 : vector<16xf32> to vector<16x1xf32>
    %cst_74 = arith.constant 3.200000e+01 : f32
    %157 = vector.broadcast %cst_74 : f32 to vector<16x1xf32>
    %158 = arith.divf %156, %157 : vector<16x1xf32>
    %cst_75 = arith.constant 9.99999974E-6 : f32
    %159 = vector.broadcast %cst_75 : f32 to vector<16x1xf32>
    %160 = arith.addf %158, %159 : vector<16x1xf32>
    %161 = math.rsqrt %160 : vector<16x1xf32>
    %162 = vector.broadcast %161 : vector<16x1xf32> to vector<16x32xf32>
    %163 = arith.mulf %153, %162 : vector<16x32xf32>
    %164 = vector.broadcast %45 : vector<1x32xf32> to vector<16x32xf32>
    %165 = arith.mulf %163, %164 : vector<16x32xf32>
    %166 = vector.broadcast %47 : vector<1x32xf32> to vector<16x32xf32>
    %167 = arith.addf %165, %166 : vector<16x32xf32>
    %cst_76 = arith.constant dense<0.000000e+00> : vector<16x64xf32>
    %168 = tpu.matmul %167, %49, %cst_76 {dimension_numbers = #tpu.dot_dimension_numbers<[1], [0], [0], [1], [0, 0, 1, 1], [], []>} : vector<16x32xf32>, vector<32x64xf32>, vector<16x64xf32> -> vector<16x64xf32>
    %169 = vector.broadcast %51 : vector<1x64xf32> to vector<16x64xf32>
    %170 = arith.addf %168, %169 : vector<16x64xf32>
    %cst_77 = arith.constant 5.000000e-01 : f32
    %171 = vector.broadcast %cst_77 : f32 to vector<16x64xf32>
    %172 = arith.mulf %171, %170 : vector<16x64xf32>
    %cst_78 = arith.constant 0.707106769 : f32
    %173 = vector.broadcast %cst_78 : f32 to vector<16x64xf32>
    %174 = arith.mulf %170, %173 : vector<16x64xf32>
    %cst_79 = arith.constant 0.000000e+00 : f32
    %175 = vector.broadcast %cst_79 : f32 to vector<16x64xf32>
    %176 = arith.cmpf oge, %174, %175 : vector<16x64xf32>
    %cst_80 = arith.constant 1.000000e+00 : f32
    %cst_81 = arith.constant -1.000000e+00 : f32
    %177 = vector.broadcast %cst_80 : f32 to vector<16x64xf32>
    %178 = vector.broadcast %cst_81 : f32 to vector<16x64xf32>
    %179 = arith.select %176, %177, %178 : vector<16x64xi1>, vector<16x64xf32>
    %180 = math.absf %174 : vector<16x64xf32>
    %cst_82 = arith.constant 0.327591091 : f32
    %181 = vector.broadcast %cst_82 : f32 to vector<16x64xf32>
    %182 = arith.mulf %181, %180 : vector<16x64xf32>
    %cst_83 = arith.constant 1.000000e+00 : f32
    %183 = vector.broadcast %cst_83 : f32 to vector<16x64xf32>
    %184 = arith.addf %183, %182 : vector<16x64xf32>
    %cst_84 = arith.constant 1.000000e+00 : f32
    %185 = vector.broadcast %cst_84 : f32 to vector<16x64xf32>
    %186 = arith.divf %185, %184 : vector<16x64xf32>
    %cst_85 = arith.constant 1.06140542 : f32
    %187 = vector.broadcast %cst_85 : f32 to vector<16x64xf32>
    %188 = arith.mulf %187, %186 : vector<16x64xf32>
    %cst_86 = arith.constant -1.45315206 : f32
    %189 = vector.broadcast %cst_86 : f32 to vector<16x64xf32>
    %190 = arith.addf %188, %189 : vector<16x64xf32>
    %191 = arith.mulf %190, %186 : vector<16x64xf32>
    %cst_87 = arith.constant 1.42141378 : f32
    %192 = vector.broadcast %cst_87 : f32 to vector<16x64xf32>
    %193 = arith.addf %191, %192 : vector<16x64xf32>
    %194 = arith.mulf %193, %186 : vector<16x64xf32>
    %cst_88 = arith.constant -0.284496725 : f32
    %195 = vector.broadcast %cst_88 : f32 to vector<16x64xf32>
    %196 = arith.addf %194, %195 : vector<16x64xf32>
    %197 = arith.mulf %196, %186 : vector<16x64xf32>
    %cst_89 = arith.constant 0.254829586 : f32
    %198 = vector.broadcast %cst_89 : f32 to vector<16x64xf32>
    %199 = arith.addf %197, %198 : vector<16x64xf32>
    %200 = arith.mulf %199, %186 : vector<16x64xf32>
    %cst_90 = arith.constant 0.000000e+00 : f32
    %201 = vector.broadcast %cst_90 : f32 to vector<16x64xf32>
    %202 = arith.subf %201, %180 : vector<16x64xf32>
    %203 = arith.mulf %202, %180 : vector<16x64xf32>
    %204 = math.exp %203 : vector<16x64xf32>
    %205 = arith.mulf %200, %204 : vector<16x64xf32>
    %cst_91 = arith.constant 1.000000e+00 : f32
    %206 = vector.broadcast %cst_91 : f32 to vector<16x64xf32>
    %207 = arith.subf %206, %205 : vector<16x64xf32>
    %208 = arith.mulf %179, %207 : vector<16x64xf32>
    %cst_92 = arith.constant 1.000000e+00 : f32
    %209 = vector.broadcast %cst_92 : f32 to vector<16x64xf32>
    %210 = arith.addf %209, %208 : vector<16x64xf32>
    %211 = arith.mulf %172, %210 : vector<16x64xf32>
    %cst_93 = arith.constant dense<0.000000e+00> : vector<16x32xf32>
    %212 = tpu.matmul %211, %53, %cst_93 {dimension_numbers = #tpu.dot_dimension_numbers<[1], [0], [0], [1], [0, 0, 1, 1], [], []>} : vector<16x64xf32>, vector<64x32xf32>, vector<16x32xf32> -> vector<16x32xf32>
    %213 = vector.broadcast %55 : vector<1x32xf32> to vector<16x32xf32>
    %214 = arith.addf %212, %213 : vector<16x32xf32>
    %215 = arith.addf %214, %147 : vector<16x32xf32>
    %c1 = arith.constant 1 : index
    %c0_94 = arith.constant 0 : index
    %c0_95 = arith.constant 0 : index
    %216 = vector.load %arg1[%c1, %c0_94, %c0_95] : memref<2x1x32xf32, #tpu.memory_space<vmem>>, vector<1x1x32xf32>
    %217 = vector.shape_cast %216 : vector<1x1x32xf32> to vector<1x32xf32>
    %c1_96 = arith.constant 1 : index
    %c0_97 = arith.constant 0 : index
    %c0_98 = arith.constant 0 : index
    %218 = vector.load %arg2[%c1_96, %c0_97, %c0_98] : memref<2x1x32xf32, #tpu.memory_space<vmem>>, vector<1x1x32xf32>
    %219 = vector.shape_cast %218 : vector<1x1x32xf32> to vector<1x32xf32>
    %c1_99 = arith.constant 1 : index
    %c0_100 = arith.constant 0 : index
    %c0_101 = arith.constant 0 : index
    %220 = vector.load %arg3[%c1_99, %c0_100, %c0_101] : memref<2x32x32xf32, #tpu.memory_space<vmem>>, vector<1x32x32xf32>
    %221 = vector.shape_cast %220 : vector<1x32x32xf32> to vector<32x32xf32>
    %c1_102 = arith.constant 1 : index
    %c0_103 = arith.constant 0 : index
    %c0_104 = arith.constant 0 : index
    %222 = vector.load %arg4[%c1_102, %c0_103, %c0_104] : memref<2x32x32xf32, #tpu.memory_space<vmem>>, vector<1x32x32xf32>
    %223 = vector.shape_cast %222 : vector<1x32x32xf32> to vector<32x32xf32>
    %c1_105 = arith.constant 1 : index
    %c0_106 = arith.constant 0 : index
    %c0_107 = arith.constant 0 : index
    %224 = vector.load %arg5[%c1_105, %c0_106, %c0_107] : memref<2x32x32xf32, #tpu.memory_space<vmem>>, vector<1x32x32xf32>
    %225 = vector.shape_cast %224 : vector<1x32x32xf32> to vector<32x32xf32>
    %c1_108 = arith.constant 1 : index
    %c0_109 = arith.constant 0 : index
    %c0_110 = arith.constant 0 : index
    %226 = vector.load %arg6[%c1_108, %c0_109, %c0_110] : memref<2x32x32xf32, #tpu.memory_space<vmem>>, vector<1x32x32xf32>
    %227 = vector.shape_cast %226 : vector<1x32x32xf32> to vector<32x32xf32>
    %c1_111 = arith.constant 1 : index
    %c0_112 = arith.constant 0 : index
    %c0_113 = arith.constant 0 : index
    %228 = vector.load %arg7[%c1_111, %c0_112, %c0_113] : memref<2x1x32xf32, #tpu.memory_space<vmem>>, vector<1x1x32xf32>
    %229 = vector.shape_cast %228 : vector<1x1x32xf32> to vector<1x32xf32>
    %c1_114 = arith.constant 1 : index
    %c0_115 = arith.constant 0 : index
    %c0_116 = arith.constant 0 : index
    %230 = vector.load %arg10[%c1_114, %c0_115, %c0_116] : memref<2x1x32xf32, #tpu.memory_space<vmem>>, vector<1x1x32xf32>
    %231 = vector.shape_cast %230 : vector<1x1x32xf32> to vector<1x32xf32>
    %c1_117 = arith.constant 1 : index
    %c0_118 = arith.constant 0 : index
    %c0_119 = arith.constant 0 : index
    %232 = vector.load %arg11[%c1_117, %c0_118, %c0_119] : memref<2x1x32xf32, #tpu.memory_space<vmem>>, vector<1x1x32xf32>
    %233 = vector.shape_cast %232 : vector<1x1x32xf32> to vector<1x32xf32>
    %c1_120 = arith.constant 1 : index
    %c0_121 = arith.constant 0 : index
    %c0_122 = arith.constant 0 : index
    %234 = vector.load %arg12[%c1_120, %c0_121, %c0_122] : memref<2x32x64xf32, #tpu.memory_space<vmem>>, vector<1x32x64xf32>
    %235 = vector.shape_cast %234 : vector<1x32x64xf32> to vector<32x64xf32>
    %c1_123 = arith.constant 1 : index
    %c0_124 = arith.constant 0 : index
    %c0_125 = arith.constant 0 : index
    %236 = vector.load %arg13[%c1_123, %c0_124, %c0_125] : memref<2x1x64xf32, #tpu.memory_space<vmem>>, vector<1x1x64xf32>
    %237 = vector.shape_cast %236 : vector<1x1x64xf32> to vector<1x64xf32>
    %c1_126 = arith.constant 1 : index
    %c0_127 = arith.constant 0 : index
    %c0_128 = arith.constant 0 : index
    %238 = vector.load %arg14[%c1_126, %c0_127, %c0_128] : memref<2x64x32xf32, #tpu.memory_space<vmem>>, vector<1x64x32xf32>
    %239 = vector.shape_cast %238 : vector<1x64x32xf32> to vector<64x32xf32>
    %c1_129 = arith.constant 1 : index
    %c0_130 = arith.constant 0 : index
    %c0_131 = arith.constant 0 : index
    %240 = vector.load %arg15[%c1_129, %c0_130, %c0_131] : memref<2x1x32xf32, #tpu.memory_space<vmem>>, vector<1x1x32xf32>
    %241 = vector.shape_cast %240 : vector<1x1x32xf32> to vector<1x32xf32>
    %cst_132 = arith.constant dense<0.000000e+00> : vector<16xf32>
    %242 = vector.multi_reduction <add>, %215, %cst_132 [1] : vector<16x32xf32> to vector<16xf32>
    %243 = vector.shape_cast %242 : vector<16xf32> to vector<16x1xf32>
    %cst_133 = arith.constant 3.200000e+01 : f32
    %244 = vector.broadcast %cst_133 : f32 to vector<16x1xf32>
    %245 = arith.divf %243, %244 : vector<16x1xf32>
    %246 = vector.broadcast %245 : vector<16x1xf32> to vector<16x32xf32>
    %247 = arith.subf %215, %246 : vector<16x32xf32>
    %248 = arith.mulf %247, %247 : vector<16x32xf32>
    %cst_134 = arith.constant dense<0.000000e+00> : vector<16xf32>
    %249 = vector.multi_reduction <add>, %248, %cst_134 [1] : vector<16x32xf32> to vector<16xf32>
    %250 = vector.shape_cast %249 : vector<16xf32> to vector<16x1xf32>
    %cst_135 = arith.constant 3.200000e+01 : f32
    %251 = vector.broadcast %cst_135 : f32 to vector<16x1xf32>
    %252 = arith.divf %250, %251 : vector<16x1xf32>
    %cst_136 = arith.constant 9.99999974E-6 : f32
    %253 = vector.broadcast %cst_136 : f32 to vector<16x1xf32>
    %254 = arith.addf %252, %253 : vector<16x1xf32>
    %255 = math.rsqrt %254 : vector<16x1xf32>
    %256 = vector.broadcast %255 : vector<16x1xf32> to vector<16x32xf32>
    %257 = arith.mulf %247, %256 : vector<16x32xf32>
    %258 = vector.broadcast %217 : vector<1x32xf32> to vector<16x32xf32>
    %259 = arith.mulf %257, %258 : vector<16x32xf32>
    %260 = vector.broadcast %219 : vector<1x32xf32> to vector<16x32xf32>
    %261 = arith.addf %259, %260 : vector<16x32xf32>
    %262 = vector.broadcast %27 : vector<1x32xf32> to vector<16x32xf32>
    %263 = arith.mulf %257, %262 : vector<16x32xf32>
    %264 = vector.broadcast %28 : vector<1x32xf32> to vector<16x32xf32>
    %265 = arith.addf %263, %264 : vector<16x32xf32>
    %cst_137 = arith.constant dense<0.000000e+00> : vector<16x32xf32>
    %266 = tpu.matmul %261, %223, %cst_137 {dimension_numbers = #tpu.dot_dimension_numbers<[1], [0], [0], [1], [0, 0, 1, 1], [], []>} : vector<16x32xf32>, vector<32x32xf32>, vector<16x32xf32> -> vector<16x32xf32>
    %cst_138 = arith.constant dense<0.000000e+00> : vector<16x32xf32>
    %267 = tpu.matmul %261, %225, %cst_138 {dimension_numbers = #tpu.dot_dimension_numbers<[1], [0], [0], [1], [0, 0, 1, 1], [], []>} : vector<16x32xf32>, vector<32x32xf32>, vector<16x32xf32> -> vector<16x32xf32>
    %268 = vector.extract_strided_slice %261 {offsets = [0, 0], sizes = [1, 32], strides = [1, 1]} : vector<16x32xf32> to vector<1x32xf32>
    %cst_139 = arith.constant dense<0.000000e+00> : vector<1x32xf32>
    %269 = tpu.matmul %268, %221, %cst_139 {dimension_numbers = #tpu.dot_dimension_numbers<[1], [0], [0], [1], [0, 0, 1, 1], [], []>} : vector<1x32xf32>, vector<32x32xf32>, vector<1x32xf32> -> vector<1x32xf32>
    %270 = vector.extract_strided_slice %266 {offsets = [0, 0], sizes = [8, 32], strides = [1, 1]} : vector<16x32xf32> to vector<8x32xf32>
    %271 = vector.extract_strided_slice %267 {offsets = [0, 0], sizes = [8, 32], strides = [1, 1]} : vector<16x32xf32> to vector<8x32xf32>
    %272 = vector.broadcast %269 : vector<1x32xf32> to vector<8x32xf32>
    %273 = arith.mulf %270, %272 : vector<8x32xf32>
    %cst_140 = arith.constant dense<0.000000e+00> : vector<8x4xf32>
    %274 = tpu.matmul %273, %13, %cst_140 {dimension_numbers = #tpu.dot_dimension_numbers<[1], [0], [0], [1], [0, 0, 1, 1], [], []>} : vector<8x32xf32>, vector<32x4xf32>, vector<8x4xf32> -> vector<8x4xf32>
    %cst_141 = arith.constant 0.353553385 : f32
    %275 = vector.broadcast %cst_141 : f32 to vector<8x4xf32>
    %276 = arith.mulf %274, %275 : vector<8x4xf32>
    %cst_142 = arith.constant dense<0xFF800000> : vector<4xf32>
    %277 = vector.multi_reduction <maximumf>, %276, %cst_142 [0] : vector<8x4xf32> to vector<4xf32>
    %278 = vector.shape_cast %277 : vector<4xf32> to vector<1x4xf32>
    %279 = vector.broadcast %278 : vector<1x4xf32> to vector<8x4xf32>
    %280 = arith.subf %276, %279 : vector<8x4xf32>
    %281 = math.exp %280 : vector<8x4xf32>
    %cst_143 = arith.constant dense<0.000000e+00> : vector<4xf32>
    %282 = vector.multi_reduction <add>, %281, %cst_143 [0] : vector<8x4xf32> to vector<4xf32>
    %283 = vector.shape_cast %282 : vector<4xf32> to vector<1x4xf32>
    %284 = tpu.reciprocal %283 {approx = true} : vector<1x4xf32> -> vector<1x4xf32>
    %285 = vector.broadcast %284 : vector<1x4xf32> to vector<8x4xf32>
    %286 = arith.mulf %281, %285 : vector<8x4xf32>
    %cst_144 = arith.constant dense<0.000000e+00> : vector<8x32xf32>
    %287 = tpu.matmul %286, %26, %cst_144 {dimension_numbers = #tpu.dot_dimension_numbers<[1], [0], [0], [1], [0, 0, 1, 1], [], []>} : vector<8x4xf32>, vector<4x32xf32>, vector<8x32xf32> -> vector<8x32xf32>
    %288 = arith.mulf %287, %271 : vector<8x32xf32>
    %cst_145 = arith.constant dense<0.000000e+00> : vector<32xf32>
    %289 = vector.multi_reduction <add>, %288, %cst_145 [0] : vector<8x32xf32> to vector<32xf32>
    %290 = vector.shape_cast %289 : vector<32xf32> to vector<1x32xf32>
    %cst_146 = arith.constant dense<0.000000e+00> : vector<1x32xf32>
    %291 = tpu.matmul %290, %227, %cst_146 {dimension_numbers = #tpu.dot_dimension_numbers<[1], [0], [0], [1], [0, 0, 1, 1], [], []>} : vector<1x32xf32>, vector<32x32xf32>, vector<1x32xf32> -> vector<1x32xf32>
    %292 = arith.addf %291, %229 : vector<1x32xf32>
    %c0_i32_147 = arith.constant 0 : i32
    %293 = vector.broadcast %c0_i32_147 : i32 to vector<16x1xi32>
    %294 = arith.cmpi eq, %0, %293 : vector<16x1xi32>
    %295 = arith.addf %268, %292 : vector<1x32xf32>
    %296 = vector.shape_cast %294 : vector<16x1xi1> to vector<16x1xi1>
    %297 = vector.broadcast %296 : vector<16x1xi1> to vector<16x32xi1>
    %298 = vector.shape_cast %295 : vector<1x32xf32> to vector<1x32xf32>
    %299 = vector.broadcast %298 : vector<1x32xf32> to vector<16x32xf32>
    %300 = arith.select %297, %299, %265 : vector<16x32xi1>, vector<16x32xf32>
    %301 = vector.extract_strided_slice %261 {offsets = [8, 0], sizes = [1, 32], strides = [1, 1]} : vector<16x32xf32> to vector<1x32xf32>
    %cst_148 = arith.constant dense<0.000000e+00> : vector<1x32xf32>
    %302 = tpu.matmul %301, %221, %cst_148 {dimension_numbers = #tpu.dot_dimension_numbers<[1], [0], [0], [1], [0, 0, 1, 1], [], []>} : vector<1x32xf32>, vector<32x32xf32>, vector<1x32xf32> -> vector<1x32xf32>
    %303 = vector.extract_strided_slice %266 {offsets = [8, 0], sizes = [8, 32], strides = [1, 1]} : vector<16x32xf32> to vector<8x32xf32>
    %304 = vector.extract_strided_slice %267 {offsets = [8, 0], sizes = [8, 32], strides = [1, 1]} : vector<16x32xf32> to vector<8x32xf32>
    %305 = vector.broadcast %302 : vector<1x32xf32> to vector<8x32xf32>
    %306 = arith.mulf %303, %305 : vector<8x32xf32>
    %cst_149 = arith.constant dense<0.000000e+00> : vector<8x4xf32>
    %307 = tpu.matmul %306, %13, %cst_149 {dimension_numbers = #tpu.dot_dimension_numbers<[1], [0], [0], [1], [0, 0, 1, 1], [], []>} : vector<8x32xf32>, vector<32x4xf32>, vector<8x4xf32> -> vector<8x4xf32>
    %cst_150 = arith.constant 0.353553385 : f32
    %308 = vector.broadcast %cst_150 : f32 to vector<8x4xf32>
    %309 = arith.mulf %307, %308 : vector<8x4xf32>
    %cst_151 = arith.constant dense<0xFF800000> : vector<4xf32>
    %310 = vector.multi_reduction <maximumf>, %309, %cst_151 [0] : vector<8x4xf32> to vector<4xf32>
    %311 = vector.shape_cast %310 : vector<4xf32> to vector<1x4xf32>
    %312 = vector.broadcast %311 : vector<1x4xf32> to vector<8x4xf32>
    %313 = arith.subf %309, %312 : vector<8x4xf32>
    %314 = math.exp %313 : vector<8x4xf32>
    %cst_152 = arith.constant dense<0.000000e+00> : vector<4xf32>
    %315 = vector.multi_reduction <add>, %314, %cst_152 [0] : vector<8x4xf32> to vector<4xf32>
    %316 = vector.shape_cast %315 : vector<4xf32> to vector<1x4xf32>
    %317 = tpu.reciprocal %316 {approx = true} : vector<1x4xf32> -> vector<1x4xf32>
    %318 = vector.broadcast %317 : vector<1x4xf32> to vector<8x4xf32>
    %319 = arith.mulf %314, %318 : vector<8x4xf32>
    %cst_153 = arith.constant dense<0.000000e+00> : vector<8x32xf32>
    %320 = tpu.matmul %319, %26, %cst_153 {dimension_numbers = #tpu.dot_dimension_numbers<[1], [0], [0], [1], [0, 0, 1, 1], [], []>} : vector<8x4xf32>, vector<4x32xf32>, vector<8x32xf32> -> vector<8x32xf32>
    %321 = arith.mulf %320, %304 : vector<8x32xf32>
    %cst_154 = arith.constant dense<0.000000e+00> : vector<32xf32>
    %322 = vector.multi_reduction <add>, %321, %cst_154 [0] : vector<8x32xf32> to vector<32xf32>
    %323 = vector.shape_cast %322 : vector<32xf32> to vector<1x32xf32>
    %cst_155 = arith.constant dense<0.000000e+00> : vector<1x32xf32>
    %324 = tpu.matmul %323, %227, %cst_155 {dimension_numbers = #tpu.dot_dimension_numbers<[1], [0], [0], [1], [0, 0, 1, 1], [], []>} : vector<1x32xf32>, vector<32x32xf32>, vector<1x32xf32> -> vector<1x32xf32>
    %325 = arith.addf %324, %229 : vector<1x32xf32>
    %c8_i32_156 = arith.constant 8 : i32
    %326 = vector.broadcast %c8_i32_156 : i32 to vector<16x1xi32>
    %327 = arith.cmpi eq, %0, %326 : vector<16x1xi32>
    %328 = arith.addf %301, %325 : vector<1x32xf32>
    %329 = vector.shape_cast %327 : vector<16x1xi1> to vector<16x1xi1>
    %330 = vector.broadcast %329 : vector<16x1xi1> to vector<16x32xi1>
    %331 = vector.shape_cast %328 : vector<1x32xf32> to vector<1x32xf32>
    %332 = vector.broadcast %331 : vector<1x32xf32> to vector<16x32xf32>
    %333 = arith.select %330, %332, %300 : vector<16x32xi1>, vector<16x32xf32>
    %cst_157 = arith.constant dense<0.000000e+00> : vector<16xf32>
    %334 = vector.multi_reduction <add>, %333, %cst_157 [1] : vector<16x32xf32> to vector<16xf32>
    %335 = vector.shape_cast %334 : vector<16xf32> to vector<16x1xf32>
    %cst_158 = arith.constant 3.200000e+01 : f32
    %336 = vector.broadcast %cst_158 : f32 to vector<16x1xf32>
    %337 = arith.divf %335, %336 : vector<16x1xf32>
    %338 = vector.broadcast %337 : vector<16x1xf32> to vector<16x32xf32>
    %339 = arith.subf %333, %338 : vector<16x32xf32>
    %340 = arith.mulf %339, %339 : vector<16x32xf32>
    %cst_159 = arith.constant dense<0.000000e+00> : vector<16xf32>
    %341 = vector.multi_reduction <add>, %340, %cst_159 [1] : vector<16x32xf32> to vector<16xf32>
    %342 = vector.shape_cast %341 : vector<16xf32> to vector<16x1xf32>
    %cst_160 = arith.constant 3.200000e+01 : f32
    %343 = vector.broadcast %cst_160 : f32 to vector<16x1xf32>
    %344 = arith.divf %342, %343 : vector<16x1xf32>
    %cst_161 = arith.constant 9.99999974E-6 : f32
    %345 = vector.broadcast %cst_161 : f32 to vector<16x1xf32>
    %346 = arith.addf %344, %345 : vector<16x1xf32>
    %347 = math.rsqrt %346 : vector<16x1xf32>
    %348 = vector.broadcast %347 : vector<16x1xf32> to vector<16x32xf32>
    %349 = arith.mulf %339, %348 : vector<16x32xf32>
    %350 = vector.broadcast %231 : vector<1x32xf32> to vector<16x32xf32>
    %351 = arith.mulf %349, %350 : vector<16x32xf32>
    %352 = vector.broadcast %233 : vector<1x32xf32> to vector<16x32xf32>
    %353 = arith.addf %351, %352 : vector<16x32xf32>
    %cst_162 = arith.constant dense<0.000000e+00> : vector<16x64xf32>
    %354 = tpu.matmul %353, %235, %cst_162 {dimension_numbers = #tpu.dot_dimension_numbers<[1], [0], [0], [1], [0, 0, 1, 1], [], []>} : vector<16x32xf32>, vector<32x64xf32>, vector<16x64xf32> -> vector<16x64xf32>
    %355 = vector.broadcast %237 : vector<1x64xf32> to vector<16x64xf32>
    %356 = arith.addf %354, %355 : vector<16x64xf32>
    %cst_163 = arith.constant 5.000000e-01 : f32
    %357 = vector.broadcast %cst_163 : f32 to vector<16x64xf32>
    %358 = arith.mulf %357, %356 : vector<16x64xf32>
    %cst_164 = arith.constant 0.707106769 : f32
    %359 = vector.broadcast %cst_164 : f32 to vector<16x64xf32>
    %360 = arith.mulf %356, %359 : vector<16x64xf32>
    %cst_165 = arith.constant 0.000000e+00 : f32
    %361 = vector.broadcast %cst_165 : f32 to vector<16x64xf32>
    %362 = arith.cmpf oge, %360, %361 : vector<16x64xf32>
    %cst_166 = arith.constant 1.000000e+00 : f32
    %cst_167 = arith.constant -1.000000e+00 : f32
    %363 = vector.broadcast %cst_166 : f32 to vector<16x64xf32>
    %364 = vector.broadcast %cst_167 : f32 to vector<16x64xf32>
    %365 = arith.select %362, %363, %364 : vector<16x64xi1>, vector<16x64xf32>
    %366 = math.absf %360 : vector<16x64xf32>
    %cst_168 = arith.constant 0.327591091 : f32
    %367 = vector.broadcast %cst_168 : f32 to vector<16x64xf32>
    %368 = arith.mulf %367, %366 : vector<16x64xf32>
    %cst_169 = arith.constant 1.000000e+00 : f32
    %369 = vector.broadcast %cst_169 : f32 to vector<16x64xf32>
    %370 = arith.addf %369, %368 : vector<16x64xf32>
    %cst_170 = arith.constant 1.000000e+00 : f32
    %371 = vector.broadcast %cst_170 : f32 to vector<16x64xf32>
    %372 = arith.divf %371, %370 : vector<16x64xf32>
    %cst_171 = arith.constant 1.06140542 : f32
    %373 = vector.broadcast %cst_171 : f32 to vector<16x64xf32>
    %374 = arith.mulf %373, %372 : vector<16x64xf32>
    %cst_172 = arith.constant -1.45315206 : f32
    %375 = vector.broadcast %cst_172 : f32 to vector<16x64xf32>
    %376 = arith.addf %374, %375 : vector<16x64xf32>
    %377 = arith.mulf %376, %372 : vector<16x64xf32>
    %cst_173 = arith.constant 1.42141378 : f32
    %378 = vector.broadcast %cst_173 : f32 to vector<16x64xf32>
    %379 = arith.addf %377, %378 : vector<16x64xf32>
    %380 = arith.mulf %379, %372 : vector<16x64xf32>
    %cst_174 = arith.constant -0.284496725 : f32
    %381 = vector.broadcast %cst_174 : f32 to vector<16x64xf32>
    %382 = arith.addf %380, %381 : vector<16x64xf32>
    %383 = arith.mulf %382, %372 : vector<16x64xf32>
    %cst_175 = arith.constant 0.254829586 : f32
    %384 = vector.broadcast %cst_175 : f32 to vector<16x64xf32>
    %385 = arith.addf %383, %384 : vector<16x64xf32>
    %386 = arith.mulf %385, %372 : vector<16x64xf32>
    %cst_176 = arith.constant 0.000000e+00 : f32
    %387 = vector.broadcast %cst_176 : f32 to vector<16x64xf32>
    %388 = arith.subf %387, %366 : vector<16x64xf32>
    %389 = arith.mulf %388, %366 : vector<16x64xf32>
    %390 = math.exp %389 : vector<16x64xf32>
    %391 = arith.mulf %386, %390 : vector<16x64xf32>
    %cst_177 = arith.constant 1.000000e+00 : f32
    %392 = vector.broadcast %cst_177 : f32 to vector<16x64xf32>
    %393 = arith.subf %392, %391 : vector<16x64xf32>
    %394 = arith.mulf %365, %393 : vector<16x64xf32>
    %cst_178 = arith.constant 1.000000e+00 : f32
    %395 = vector.broadcast %cst_178 : f32 to vector<16x64xf32>
    %396 = arith.addf %395, %394 : vector<16x64xf32>
    %397 = arith.mulf %358, %396 : vector<16x64xf32>
    %cst_179 = arith.constant dense<0.000000e+00> : vector<16x32xf32>
    %398 = tpu.matmul %397, %239, %cst_179 {dimension_numbers = #tpu.dot_dimension_numbers<[1], [0], [0], [1], [0, 0, 1, 1], [], []>} : vector<16x64xf32>, vector<64x32xf32>, vector<16x32xf32> -> vector<16x32xf32>
    %399 = vector.broadcast %241 : vector<1x32xf32> to vector<16x32xf32>
    %400 = arith.addf %398, %399 : vector<16x32xf32>
    %401 = arith.addf %400, %333 : vector<16x32xf32>
    %c0_180 = arith.constant 0 : index
    %c0_181 = arith.constant 0 : index
    %402 = vector.load %arg16[%c0_180, %c0_181] : memref<16x32xf32, #tpu.memory_space<vmem>>, vector<16x32xf32>
    tpu.vector_store %arg16[%c0_180, %c0_181], %401 {strides = array<i32>} : memref<16x32xf32, #tpu.memory_space<vmem>>, vector<16x32xf32>,
    return
  }
}

</mosaic_0001>

<bundles_post_ra>
// kernel: tpu_custom_call.1
= control target key start
LH: loop header
LB: loop body
LE: loop exit
PB: predicated region body
PF: predicated region fallthrough
CT: control target
= control target key end

     0   :  { %s3973_s0 = inlined_call_operand.hbm [shape: f32[16,32], index: 0, kind: input, shape index: {}]   ;;  %s3974_s1 = inlined_call_operand.vmem [shape: f32[2,1,32], index: 1, kind: input, shape index: {}]   ;;  %s3975_s2 = inlined_call_operand.vmem [shape: f32[2,1,32], index: 2, kind: input, shape index: {}]   ;;  %s3976_s3 = inlined_call_operand.vmem [shape: f32[2,32,32], index: 3, kind: input, shape index: {}]   ;;  %s3977_s4 = inlined_call_operand.vmem [shape: f32[2,32,32], index: 4, kind: input, shape index: {}]   ;;  %s3978_s5 = inlined_call_operand.vmem [shape: f32[2,32,32], index: 5, kind: input, shape index: {}]   ;;  %s3979_s6 = inlined_call_operand.hbm [shape: f32[2,32,32], index: 6, kind: input, shape index: {}]   ;;  %s3980_s7 = inlined_call_operand.vmem [shape: f32[2,1,32], index: 7, kind: input, shape index: {}]   ;;  %s3981_s8 = inlined_call_operand.vmem [shape: f32[1,32], index: 8, kind: input, shape index: {}]   ;;  %s3982_s9 = inlined_call_operand.vmem [shape: f32[1,32], index: 9, kind: input, shape index: {}]   ;;  %s3983_s10 = inlined_call_operand.vmem [shape: f32[2,1,32], index: 10, kind: input, shape index: {}]   ;;  %s3984_s11 = inlined_call_operand.vmem [shape: f32[2,1,32], index: 11, kind: input, shape index: {}]   ;;  %s3985_s12 = inlined_call_operand.hbm [shape: f32[2,32,64], index: 12, kind: input, shape index: {}]   ;;  %s3986_s13 = inlined_call_operand.vmem [shape: f32[2,1,64], index: 13, kind: input, shape index: {}]   ;;  %s3987_s14 = inlined_call_operand.vmem [shape: f32[2,64,32], index: 14, kind: input, shape index: {}]   ;;  %s3988_s15 = inlined_call_operand.vmem [shape: f32[2,1,32], index: 15, kind: input, shape index: {}]   ;;  %s3989_s16 = inlined_call_operand.hbm [shape: f32[16,32], index: 16, kind: output, shape index: {}]  }
   0x1   :  { %3991 = sst [smem:[#allocation12_spill]] %s3973_s0 }
   0x2   :  { %21 = vsyncpa [#allocation3], 0 }
   0x3   :  { %22 = vsyncpa [#allocation6], 0 }
   0x4   :  { %23 = vsyncpa [#allocation4], 0  ;;  %s3319_s21 = smov [#allocation5]   ;;  %s3320_s23 = smov [#allocation2]  }
   0x5   :  { %s51_s22 = sshll.u32 %s3319_s21, 4  ;;  %s29_s24 = sshll.u32 %s3320_s23, 4  ;;  %s52_s22 = int_to_ptr.vmem [resolvable:$true] %s51_s22  ;;  %s3415_s24 = int_to_ptr.vmem [resolvable:$true] %s29_s24 }
   0x6   :  { %s3225_s27 = scalar_lea.hbm %s3979_s6, 1024 }
   0x7   :  { %p3226_p0 = scmp.ne.s32.totalorder %s3979_s6, %s3225_s27  ;;  %p3229_p1 = scmp.lt.u32.totalorder %s3225_s27, %s3979_s6 }
   0x9   :  { %p3231_p2 = pnand %p3229_p1, %p3226_p0 }
   0xb   :  { %3234 = shalt.err (!%p3231_p2)
}
   0xc   :  { %s3235_s17 = scalar_lea.vmem %s52_s22, 1024  ;;  %p3240_p4 = scmp.lt.s32.totalorder %s52_s22, %s52_s22 }
   0xd   :  { %p3236_p3 = scmp.ne.s32.totalorder %s52_s22, %s3235_s17  ;;  %p3241_p5 = scmp.lt.s32.totalorder %s3235_s17, %s3235_s17 }
   0xf   :  { %p3242_p6 = por %p3241_p5, %p3240_p4 }
  0x11   :  { %p3243_p7 = pnand %p3242_p6, %p3236_p3 }
  0x13   :  { %3246 = shalt.err (!%p3243_p7)
}
  0x14   :  { %s3321_s18 = smov 128   ;;  %s3322_s19 = smov 8  }
  0x15   :  { %57 = dma.hbm_to_vmem [thread:$0]  %s3979_s6, 1024, %s52_s22, [#allocation6], %s3321_s18, %s3321_s18, %s3322_s19  }
  0x16   :  { %s3992_s26 = sld [smem:[#allocation12_spill]] }
  0x1c   :  { %s3247_s27 = scalar_lea.hbm %s3992_s26, 256 }
  0x1d   :  { %p3248_p8 = scmp.ne.s32.totalorder %s3992_s26, %s3247_s27  ;;  %p3251_p9 = scmp.lt.u32.totalorder %s3247_s27, %s3992_s26 }
  0x1f   :  { %p3253_p10 = pnand %p3251_p9, %p3248_p8 }
  0x21   :  { %3256 = shalt.err (!%p3253_p10)
}
  0x22   :  { %s3257_s17 = scalar_lea.vmem %s3415_s24, 256  ;;  %p3262_p12 = scmp.lt.s32.totalorder %s3415_s24, %s3415_s24 }
  0x23   :  { %p3258_p11 = scmp.ne.s32.totalorder %s3415_s24, %s3257_s17  ;;  %p3263_p13 = scmp.lt.s32.totalorder %s3257_s17, %s3257_s17 }
  0x25   :  { %p3264_p0 = por %p3263_p13, %p3262_p12 }
  0x27   :  { %p3265_p1 = pnand %p3264_p0, %p3258_p11 }
  0x29   :  { %3268 = shalt.err (!%p3265_p1)
}
  0x2a   :  { %35 = dma.hbm_to_vmem [thread:$0]  %s3992_s26, 256, %s3415_s24, [#allocation3], %s3321_s18, %s3321_s18, %s3322_s19  }
  0x2b   :  { %s3323_s20 = smov [#allocation7]   ;;  %s3269_s27 = scalar_lea.hbm %s3985_s12, 1024 }
  0x2c   :  { %s73_s21 = sshll.u32 %s3323_s20, 4  ;;  %p3270_p2 = scmp.ne.s32.totalorder %s3985_s12, %s3269_s27  ;;  %s74_s21 = int_to_ptr.vmem [resolvable:$true] %s73_s21 }
  0x2d   :  { %p3273_p3 = scmp.lt.u32.totalorder %s3269_s27, %s3985_s12 }
  0x2f   :  { %p3275_p4 = pnand %p3273_p3, %p3270_p2 }
  0x31   :  { %3278 = shalt.err (!%p3275_p4)
}
  0x32   :  { %s3279_s17 = scalar_lea.vmem %s74_s21, 1024  ;;  %p3284_p6 = scmp.lt.s32.totalorder %s74_s21, %s74_s21 }
  0x33   :  { %p3280_p5 = scmp.ne.s32.totalorder %s74_s21, %s3279_s17  ;;  %p3285_p7 = scmp.lt.s32.totalorder %s3279_s17, %s3279_s17 }
  0x35   :  { %p3286_p8 = por %p3285_p7, %p3284_p6 }
  0x37   :  { %p3287_p9 = pnand %p3286_p8, %p3280_p5 }
  0x39   :  { %3290 = shalt.err (!%p3287_p9)
}
  0x3a   :  { %79 = dma.hbm_to_vmem [thread:$0]  %s3985_s12, 1024, %s74_s21, [#allocation6], %s3321_s18, %s3321_s18, %s3322_s19  }
  0x3b   :  { %3313 = dma.done.wait [#allocation3], 256  }
  0x3c   :  { %3314 = vsyncadd [#allocation3], 4294967040 }
  0x3d   :  { %3315 = dma.done.wait [#allocation6], 2048  }
  0x3e   :  { %3316 = vsyncadd [#allocation6], 4294965248  ;;  %vm172_vm0 = vcmask 261120   ;;  %v135_v0 = vld [vmem:[#allocation2] sm:$0xff]  ;;  %v136_v1 = vld [vmem:[#allocation2 + $0x8] sm:$0xff]  ;;  %v3324_v17 = vmov 0.0|0.0   ;;  %v95_v50 = vlaneseq }
  0x3f   :  { %v173_v2 = vsel %vm172_vm0, %v135_v0, 0.0  ;;  %v176_v3 = vsel %vm172_vm0, %v136_v1, 0.0  ;;  %v139_v14 = vld [vmem:[%s3976_s3] sm:$0xff]  ;;  %v140_v15 = vld [vmem:[%s3976_s3 + $0x8] sm:$0xff]  ;;  %3030 = vmatprep.subr.bf16.mxu0 %v3324_v17  ;;  %v141_v20 = vld [vmem:[%s3976_s3 + $0x10] sm:$0xff]  ;;  %vm3325_vm1 = vmmov 0  }
  0x40   :  { %174 = vadd.xlane.f32.xlu0 %v173_v2  ;;  %v143_v16 = vld [vmem:[%s3977_s4] sm:$0xff]  ;;  %v3481_v18 = vpack.c.bf16 %v140_v15, %v139_v14  ;;  %v144_v19 = vld [vmem:[%s3977_s4 + $0x8] sm:$0xff]  ;;  %v142_v21 = vld [vmem:[%s3976_s3 + $0x18] sm:$0xff]  ;;  %v3326_v22 = vmov 0.0   ;;  %v3549_v51 = vshrl.u32 %v95_v50, 7  ;;  %v101_v52 = vand.u32 127, %v95_v50 }
  0x41   :  { %2788 = vmatprep.mubr.msk.f32.mxu0 %vm3325_vm1, %v3326_v22  ;;  %v3014_v23 = vpack.c.bf16 %v144_v19, %v143_v16  ;;  %v145_v24 = vld [vmem:[%s3977_s4 + $0x10] sm:$0xff]  ;;  %v146_v25 = vld [vmem:[%s3977_s4 + $0x18] sm:$0xff]  ;;  %v3501_v26 = vpack.c.bf16 %v142_v21, %v141_v20  ;;  %v147_v28 = vld [vmem:[%s3978_s5] sm:$0xff]  ;;  %v3327_v60 = vmov 1.0|1.0   ;;  %s3329_s22 = smov [#allocation8]  }
  0x42   :  { %3032 = vmatpush3.bf16.msra.mxu0 %v3481_v18  ;;  %v3018_v27 = vpack.c.bf16 %v146_v25, %v145_v24  ;;  %v148_v29 = vld [vmem:[%s3978_s5 + $0x8] sm:$0xff]  ;;  %v2541_v38 = vld [vmem:[%s3974_s1] ss:$0 sm:$0xff]  ;;  %v149_v45 = vld [vmem:[%s3978_s5 + $0x10] sm:$0xff]  ;;  %v107_v53 = vadd.s32 1, %v101_v52  ;;  %v3552_v54 = vadd.s32 8, %v3549_v51 }
  0x43   :  { %3015 = vmatprep.subr.bf16.mxu1 %v3014_v23  ;;  %3033 = vmatprep.subr.bf16.mxu0 %v3324_v17  ;;  %v3022_v30 = vpack.c.bf16 %v148_v29, %v147_v28  ;;  %v2542_v40 = vld [vmem:[%s3975_s2] ss:$0 sm:$0xff]  ;;  %v150_v46 = vld [vmem:[%s3978_s5 + $0x18] sm:$0xff]  ;;  %v102_v55 = vmul.u32 8, %v101_v52  ;;  %v98_v57 = vadd.s32 16, %v3549_v51  ;;  %v99_v58 = vadd.s32 24, %v3549_v51 }
  0x44   :  { %177 = vadd.xlane.f32.xlu0 %v176_v3  ;;  %3017 = vmatpush3.bf16.msra.mxu1 %v3014_v23  ;;  %v3026_v49 = vpack.c.bf16 %v150_v46, %v149_v45  ;;  %v108_v56 = vmul.u32 8, %v107_v53  ;;  %v3577_v63 = vsub.s32 0, %v3549_v51 }
  0x45   :  { %3019 = vmatprep.subr.bf16.mxu1 %v3018_v27  ;;  %vm103_vm2 = vcmp.ge.s32.totalorder %v3549_v51, %v102_v55  ;;  %vm104_vm3 = vcmp.ge.s32.totalorder %v3552_v54, %v102_v55  ;;  %vm105_vm9 = vcmp.ge.s32.totalorder %v98_v57, %v102_v55  ;;  %vm106_vm10 = vcmp.ge.s32.totalorder %v99_v58, %v102_v55 }
  0x46   :  { %3035 = vmatpush3.bf16.msra.mxu0 %v3501_v26  ;;  %vm109_vm4 = vcmp.lt.s32.totalorder %v3549_v51, %v108_v56  ;;  %vm110_vm5 = vcmp.lt.s32.totalorder %v3552_v54, %v108_v56  ;;  %vm111_vm11 = vcmp.lt.s32.totalorder %v98_v57, %v108_v56  ;;  %vm112_vm12 = vcmp.lt.s32.totalorder %v99_v58, %v108_v56 }
  0x47   :  { %2802 = vmatprep.subr.mxu0 %v3326_v22  ;;  %vm113_vm6 = vmand %vm103_vm2, %vm109_vm4  ;;  %vm560_vm4 = vcmask 1043456  }
  0x48   :  { %3021 = vmatpush3.bf16.msra.mxu1 %v3018_v27  ;;  %vm114_vm7 = vmand %vm104_vm3, %vm110_vm5 }
  0x49   :  { %3023 = vmatprep.subr.bf16.mxu1 %v3022_v30  ;;  %vm3560_vm8 = vmpackc.low %vm114_vm7, %vm113_vm6  ;;  %vm537_vm6 = vcmask 31744   ;;  %vm715_vm7 = vcmp.eq.s32.totalorder %v3549_v51, 0 }
  0x4a   :  { %vm115_vm13 = vmand %vm105_vm9, %vm111_vm11  ;;  %vm1051_vm9 = vcmp.eq.s32.totalorder %v3552_v54, 8  ;;  %v1369_v54 = vld [vmem:[#allocation7 + $0x30] sm:$0xff] }
  0x4b   :  { %vm116_vm14 = vmand %vm106_vm10, %vm112_vm12  ;;  %vm1252_vm12 = vcmask 523264  }
  0x4c   :  { %vm3568_vm15 = vmpackc.low %vm116_vm14, %vm115_vm13 }
  0xcd   :  { %v175_v4 = vpop.xlane.xlu0 %174 }
  0xce   :  { %v180_v5 = vmul.f32 0.03125, %v175_v4 }
  0xd0   :  { %v182_v6 = vsub.f32 %v135_v0, %v180_v5 }
  0xd1   :  { %v178_v7 = vpop.xlane.xlu0 %177 }
  0xd2   :  { %v181_v8 = vmul.f32 0.03125, %v178_v7  ;;  %v184_v9 = vmul.f32 %v182_v6, %v182_v6  ;;  %v125_v7 = vmul.u32 8, %v3549_v51 }
  0xd4   :  { %v183_v10 = vsub.f32 %v136_v1, %v181_v8  ;;  %v186_v11 = vsel %vm172_vm0, %v184_v9, 0.0  ;;  %v127_v8 = vadd.s32 1, %v3549_v51  ;;  %vm126_vm2 = vcmp.ge.s32.totalorder %v101_v52, %v125_v7 }
  0xd5   :  { %187 = vadd.xlane.f32.xlu1 %v186_v11 }
  0xd6   :  { %v185_v12 = vmul.f32 %v183_v10, %v183_v10  ;;  %v128_v9 = vmul.u32 8, %v127_v8  ;;  %v3649_v8 = vld [vmem:[%s3982_s9] ss:$0 sm:$0xff] }
  0xd8   :  { %v189_v13 = vsel %vm172_vm0, %v185_v12, 0.0  ;;  %vm129_vm3 = vcmp.lt.s32.totalorder %v101_v52, %v128_v9 }
  0xd9   :  { %190 = vadd.xlane.f32.xlu1 %v189_v13  ;;  %vm130_vm5 = vmand %vm126_vm2, %vm129_vm3 }
 0x162   :  { %v188_v31 = vpop.xlane.xlu1 %187 }
 0x163   :  { %v192_v32 = vmul.f32 0.03125, %v188_v31 }
 0x165   :  { %v194_v33 = vadd.f32 1e-05, %v192_v32 }
 0x166   :  { %v191_v34 = vpop.xlane.xlu1 %190 }
 0x167   :  { %3177 = vrsqrt.f32 %v194_v33  ;;  %v193_v35 = vmul.f32 0.03125, %v191_v34 }
 0x169   :  { %v195_v36 = vadd.f32 1e-05, %v193_v35 }
 0x16b   :  { %3179 = vrsqrt.f32 %v195_v36 }
 0x171   :  { %v3178_v37 = vpop.eup %3177 }
 0x172   :  { %v3515_v39 = vmul.f32 %v3178_v37, %v182_v6  ;;  %v152_v37 = vld [vmem:[#allocation5 + $0x8] sm:$0xff] }
 0x174   :  { %v206_v41 = vmul.f32 %v2541_v38, %v3515_v39 }
 0x175   :  { %v3180_v42 = vpop.eup %3179 }
 0x176   :  { %v3521_v43 = vadd.f32 %v2542_v40, %v206_v41  ;;  %v3523_v44 = vmul.f32 %v3180_v42, %v183_v10  ;;  %v3590_v10 = vsel %vm130_vm5, 1.0, %v3326_v22 }
 0x178   :  { %2766 = vmatprep.mubr.msk.f32.mxu1 %vm172_vm0, %v3521_v43  ;;  %2789 = vmatmul.mubr.msk.f32.vlgmr.msra.gmra.mrb[0].mxu0 %vm172_vm0, %v3521_v43  ;;  %v207_v47 = vmul.f32 %v2541_v38, %v3523_v44 }
 0x179   :  { %2804 = vmatprep.mubr.msk.f32.mxu0 %vm3325_vm1, %v3326_v22  ;;  %2803 = vmatpush3.msk.msra.mxu0 %vm560_vm4, %v3590_v10 }
 0x17a   :  { %v3538_v48 = vadd.f32 %v2542_v40, %v207_v47  ;;  %3048 = vmatprep.subr.bf16.mxu0 %v3324_v17  ;;  %v154_v40 = vld [vmem:[#allocation5 + $0x18] sm:$0xff] }
 0x17c   :  { %2767 = vmatmul.mubr.msk.f32.vlgmr.msra.gmra.mrb[0].mxu1 %vm172_vm0, %v3538_v48 }
 0x17d   :  { %3025 = vmatpush3.bf16.msra.mxu1 %v3022_v30  ;;  %2777 = vmatprep.mubr.msk.f32.mxu1 %vm172_vm0, %v3521_v43 }
 0x17e   :  { %3027 = vmatprep.subr.bf16.mxu1 %v3026_v49 }
 0x181   :  { %3029 = vmatpush3.bf16.msra.mxu1 %v3026_v49 }
 0x182   :  { %3036 = vmatprep.subr.bf16.mxu1 %v3324_v17 }
 0x184   :  { %2778 = vmatmul.mubr.msk.f32.vlgmr.msra.gmra.mrb[2].mxu1 %vm172_vm0, %v3538_v48 }
 0x185   :  { %2799 = vmatprep.mubr.msk.f32.mxu1 %vm3325_vm1, %v3326_v22  ;;  %3038 = vmatpush3.bf16.msk.msra.mxu1 %vm3560_vm8, %v3327_v60 }
 0x186   :  { %3039 = vmatprep.subr.bf16.mxu1 %v3324_v17 }
 0x189   :  { %3041 = vmatpush3.bf16.msk.msra.mxu1 %vm3568_vm15, %v3327_v60 }
 0x18a   :  { %3042 = vmatprep.subr.bf16.mxu1 %v3324_v17 }
 0x24b   :  { %v454_v62 = vpop.f32.mrb[0].mxu0 }
 0x24c   :  { %v2790_v0 = vpop.f32.mrb[1].mxu0  ;;  %v461_v1 = vrot.slane %v454_v62, %v3577_v63 }
 0x24f   :  { %v3580_v2 = vpop.f32.mrb[0].mxu1 }
 0x250   :  { %v304_v3 = vpop.f32.mrb[1].mxu1 }
 0x251   :  { %v462_v4 = vmul.f32 %v461_v1, %v304_v3  ;;  %v3636_v1 = vld [vmem:[%s3980_s7] sm:$0x1] }
 0x253   :  { %2800 = vmatmul.mubr.msk.f32.vlgmr.msra.gmra.mrb[4].mxu1 %vm172_vm0, %v462_v4 }
 0x254   :  { %2815 = vmatprep.mubr.msk.f32.mxu1 %vm3325_vm1, %v3326_v22 }
 0x257   :  { %v3585_v5 = vpop.f32.mrb[2].mxu1 }
 0x258   :  { %v379_v6 = vpop.f32.mrb[3].mxu1 }
 0x326   :  { %v532_v11 = vpop.f32.mrb[4].mxu1 }
 0x327   :  { %v536_v12 = vmul.f32 0.35355338, %v532_v11  ;;  %v2801_v13 = vpop.f32.mrb[5].mxu1 }
 0x329   :  { %v538_v14 = vsel %vm537_vm6, %v536_v12, -inf }
 0x32a   :  { %v539_v15 = vrot.slane %v538_v14, 4 }
 0x32c   :  { %v540_v16 = vmax.f32 %v538_v14, %v539_v15 }
 0x32e   :  { %v541_v19 = vrot.slane %v540_v16, 2 }
 0x330   :  { %v542_v20 = vmax.f32 %v540_v16, %v541_v19 }
 0x332   :  { %v543_v21 = vrot.slane %v542_v20, 1 }
 0x334   :  { %v544_v23 = vmax.f32 %v542_v20, %v543_v21 }
 0x336   :  { %v545_v24 = vsub.f32 %v536_v12, %v544_v23 }
 0x338   :  { %v546_v25 = vmul.f32 1.442695, %v545_v24 }
 0x33a   :  { %3181 = vpow2.f32 %v546_v25 }
 0x344   :  { %v3182_v27 = vpop.eup %3181 }
 0x345   :  { %v548_v28 = vsel %vm537_vm6, %v3182_v27, 0.0 }
 0x346   :  { %v549_v29 = vrot.slane %v548_v28, 4 }
 0x348   :  { %v550_v30 = vadd.f32 %v549_v29, %v548_v28 }
 0x34a   :  { %v551_v31 = vrot.slane %v550_v30, 2 }
 0x34c   :  { %v552_v32 = vadd.f32 %v551_v31, %v550_v30 }
 0x34e   :  { %v553_v33 = vrot.slane %v552_v32, 1 }
 0x350   :  { %v554_v34 = vadd.f32 %v553_v33, %v552_v32 }
 0x352   :  { %3183 = vrcp.f32 %v554_v34 }
 0x35c   :  { %v3184_v35 = vpop.eup %3183 }
 0x35d   :  { %v556_v36 = vmul.f32 %v3184_v35, %v3182_v27 }
 0x35f   :  { %2805 = vmatmul.mubr.msk.f32.vlgmr.msra.gmra.mrb[2].mxu0 %vm537_vm6, %v556_v36 }
 0x360   :  { %3050 = vmatpush3.bf16.msra.mxu0 %v3481_v18  ;;  %2826 = vmatprep.mubr.msk.f32.mxu0 %vm3325_vm1, %v3326_v22  ;;  %v151_v18 = vld [vmem:[#allocation5] sm:$0xff] }
 0x361   :  { %3051 = vmatprep.subr.bf16.mxu0 %v3324_v17  ;;  %v3611_v38 = vpack.c.bf16 %v152_v37, %v151_v18 }
 0x363   :  { %3044 = vmatpush3.bf16.msra.mxu1 %v3611_v38 }
 0x364   :  { %3053 = vmatpush3.bf16.msra.mxu0 %v3501_v26  ;;  %3045 = vmatprep.subr.bf16.mxu1 %v3324_v17  ;;  %v153_v26 = vld [vmem:[#allocation5 + $0x10] sm:$0xff] }
 0x365   :  { %2840 = vmatprep.subr.mxu0 %v3326_v22  ;;  %v3615_v41 = vpack.c.bf16 %v154_v40, %v153_v26 }
 0x367   :  { %2827 = vmatmul.mubr.msk.f32.vlgmr.msra.gmra.mrb[4].mxu0 %vm172_vm0, %v3538_v48  ;;  %3047 = vmatpush3.bf16.msra.mxu1 %v3615_v41 }
 0x368   :  { %2841 = vmatpush3.msk.msra.mxu0 %vm560_vm4, %v3590_v10  ;;  %2842 = vmatprep.mubr.msk.f32.mxu0 %vm3325_vm1, %v3326_v22 }
 0x369   :  { %3060 = vmatprep.subr.bf16.mxu0 %v3324_v17  ;;  %3054 = vmatprep.subr.bf16.mxu1 %v3324_v17 }
 0x432   :  { %v630_v42 = vpop.f32.mrb[2].mxu0 }
 0x433   :  { %v634_v45 = vmul.f32 %v630_v42, %v379_v6  ;;  %v2806_v46 = vpop.f32.mrb[3].mxu0 }
 0x435   :  { %v635_v47 = vsel %vm172_vm0, %v634_v45, 0.0 }
 0x436   :  { %v636_v49 = vrot.slane %v635_v47, 4 }
 0x438   :  { %v637_v50 = vadd.f32 %v636_v49, %v635_v47 }
 0x43a   :  { %v638_v52 = vrot.slane %v637_v50, 2  ;;  %v794_v53 = vpop.f32.mrb[4].mxu0 }
 0x43b   :  { %v801_v55 = vrot.slane %v794_v53, %v3577_v63  ;;  %v2828_v56 = vpop.f32.mrb[5].mxu0 }
 0x43c   :  { %v639_v57 = vadd.f32 %v638_v52, %v637_v50 }
 0x43d   :  { %v802_v58 = vmul.f32 %v3580_v2, %v801_v55  ;;  %v3641_v2 = vld [vmem:[%s3981_s8] ss:$0 sm:$0xff] }
 0x43e   :  { %v640_v62 = vrot.slane %v639_v57, 1  ;;  %v222_v7 = vmul.f32 %v3641_v2, %v3515_v39 }
 0x440   :  { %v641_v0 = vadd.f32 %v640_v62, %v639_v57  ;;  %v230_v12 = vadd.f32 %v3649_v8, %v222_v7 }
 0x442   :  { %2816 = vmatmul.mubr.msk.f32.vlgmr.msra.gmra.mrb[6].mxu1 %vm172_vm0, %v641_v0 }
 0x443   :  { %3056 = vmatpush3.bf16.msk.msra.mxu1 %vm3560_vm8, %v3327_v60  ;;  %2837 = vmatprep.mubr.msk.f32.mxu1 %vm3325_vm1, %v3326_v22 }
 0x444   :  { %3057 = vmatprep.subr.bf16.mxu1 %v3324_v17 }
 0x447   :  { %3059 = vmatpush3.bf16.msk.msra.mxu1 %vm3568_vm15, %v3327_v60 }
 0x44a   :  { %2838 = vmatmul.mubr.msk.f32.vlgmr.msra.gmra.mrb[8].mxu1 %vm172_vm0, %v802_v58 }
 0x515   :  { %v711_v3 = vpop.f32.mrb[6].mxu1 }
 0x516   :  { %v712_v4 = vadd.f32 %v711_v3, %v3636_v1  ;;  %v2817_v6 = vpop.f32.mrb[7].mxu1 }
 0x517   :  { %v2568_v6 = vld [vmem:[%s3984_s11] ss:$0 sm:$0xff] }
 0x518   :  { %v717_v9 = vadd.f32 %v712_v4, %v3521_v43 }
 0x51a   :  { %v725_v11 = vrot.slane %v717_v9, %v3577_v63 }
 0x51c   :  { %v3657_v13 = vsel %vm715_vm7, %v725_v11, %v230_v12 }
 0x51d   :  { %v872_v14 = vpop.f32.mrb[8].mxu1  ;;  %v1063_v39 = vsel %vm172_vm0, %v3657_v13, 0.0 }
 0x51e   :  { %v876_v15 = vmul.f32 0.35355338, %v872_v14  ;;  %v2839_v16 = vpop.f32.mrb[9].mxu1  ;;  %1064 = vadd.xlane.f32.xlu0 %v1063_v39  ;;  %v223_v39 = vmul.f32 %v3641_v2, %v3523_v44 }
 0x520   :  { %v877_v19 = vsel %vm537_vm6, %v876_v15, -inf }
 0x521   :  { %v878_v43 = vrot.slane %v877_v19, 4 }
 0x523   :  { %v879_v20 = vmax.f32 %v877_v19, %v878_v43  ;;  %v231_v19 = vadd.f32 %v3649_v8, %v223_v39 }
 0x525   :  { %v880_v21 = vrot.slane %v879_v20, 2 }
 0x527   :  { %v881_v23 = vmax.f32 %v879_v20, %v880_v21 }
 0x529   :  { %v882_v24 = vrot.slane %v881_v23, 1 }
 0x52b   :  { %v883_v25 = vmax.f32 %v881_v23, %v882_v24  ;;  %v158_v24 = vld [vmem:[#allocation7] sm:$0xff] }
 0x52d   :  { %v884_v27 = vsub.f32 %v876_v15, %v883_v25  ;;  %v159_v25 = vld [vmem:[#allocation7 + $0x8] sm:$0xff] }
 0x52f   :  { %v885_v28 = vmul.f32 1.442695, %v884_v27  ;;  %v3066_v27 = vpack.c.bf16 %v159_v25, %v158_v24 }
 0x531   :  { %3185 = vpow2.f32 %v885_v28  ;;  %3067 = vmatprep.subr.bf16.mxu1 %v3066_v27  ;;  %v160_v28 = vld [vmem:[#allocation7 + $0x10] sm:$0xff] }
 0x532   :  { %3069 = vmatpush3.bf16.msra.mxu1 %v3066_v27 }
 0x53b   :  { %v3186_v29 = vpop.eup %3185 }
 0x53c   :  { %v887_v30 = vsel %vm537_vm6, %v3186_v29, 0.0 }
 0x53d   :  { %v888_v31 = vrot.slane %v887_v30, 4 }
 0x53f   :  { %v889_v32 = vadd.f32 %v888_v31, %v887_v30 }
 0x541   :  { %v890_v33 = vrot.slane %v889_v32, 2 }
 0x543   :  { %v891_v34 = vadd.f32 %v890_v33, %v889_v32 }
 0x545   :  { %v892_v35 = vrot.slane %v891_v34, 1 }
 0x547   :  { %v893_v36 = vadd.f32 %v892_v35, %v891_v34 }
 0x549   :  { %3187 = vrcp.f32 %v893_v36 }
 0x553   :  { %v3188_v18 = vpop.eup %3187 }
 0x554   :  { %v895_v37 = vmul.f32 %v3188_v18, %v3186_v29  ;;  %v161_v29 = vld [vmem:[#allocation7 + $0x18] sm:$0xff] }
 0x555   :  { %v3070_v30 = vpack.c.bf16 %v161_v29, %v160_v28 }
 0x556   :  { %2843 = vmatmul.mubr.msk.f32.vlgmr.msra.gmra.mrb[6].mxu0 %vm537_vm6, %v895_v37  ;;  %v163_v37 = vld [vmem:[%s3987_s14] sm:$0xff] }
 0x557   :  { %3062 = vmatpush3.bf16.msra.mxu0 %v3611_v38  ;;  %2853 = vmatprep.mubr.msk.f32.mxu0 %vm3325_vm1, %v3326_v22 }
 0x558   :  { %3063 = vmatprep.subr.bf16.mxu0 %v3324_v17  ;;  %3071 = vmatprep.subr.bf16.mxu1 %v3070_v30 }
 0x559   :  { %3073 = vmatpush3.bf16.msra.mxu1 %v3070_v30 }
 0x55b   :  { %3065 = vmatpush3.bf16.msra.mxu0 %v3615_v41 }
 0x5ab   :  { %v1065_v26 = vpop.xlane.xlu0 %1064 }
 0x5ac   :  { %v1069_v40 = vmul.f32 0.03125, %v1065_v26  ;;  %v164_v26 = vld [vmem:[%s3987_s14 + $0x8] sm:$0xff] }
 0x5ae   :  { %v1071_v42 = vsub.f32 %v3657_v13, %v1069_v40  ;;  %v3074_v40 = vpack.c.bf16 %v164_v26, %v163_v37 }
 0x5b0   :  { %v1073_v45 = vmul.f32 %v1071_v42, %v1071_v42  ;;  %3075 = vmatprep.subr.bf16.mxu0 %v3074_v40 }
 0x5b2   :  { %v1075_v46 = vsel %vm172_vm0, %v1073_v45, 0.0  ;;  %v166_v45 = vld [vmem:[%s3987_s14 + $0x18] sm:$0xff] }
 0x5b3   :  { %1076 = vadd.xlane.f32.xlu0 %v1075_v46 }
 0x629   :  { %v965_v47 = vpop.f32.mrb[6].mxu0 }
 0x62a   :  { %v969_v49 = vmul.f32 %v3585_v5, %v965_v47  ;;  %v2844_v50 = vpop.f32.mrb[7].mxu0  ;;  %v2567_v5 = vld [vmem:[%s3983_s10] ss:$0 sm:$0xff] }
 0x62b   :  { %v167_v47 = vld [vmem:[%s3987_s14 + $0x20] sm:$0xff] }
 0x62c   :  { %v970_v38 = vsel %vm172_vm0, %v969_v49, 0.0  ;;  %v168_v49 = vld [vmem:[%s3987_s14 + $0x28] sm:$0xff] }
 0x62d   :  { %v971_v52 = vrot.slane %v970_v38, 4  ;;  %v3082_v50 = vpack.c.bf16 %v168_v49, %v167_v47 }
 0x62f   :  { %v972_v53 = vadd.f32 %v971_v52, %v970_v38  ;;  %v169_v38 = vld [vmem:[%s3987_s14 + $0x30] sm:$0xff]  ;;  %v170_v52 = vld [vmem:[%s3987_s14 + $0x38] sm:$0xff] }
 0x631   :  { %v973_v55 = vrot.slane %v972_v53, 2 }
 0x633   :  { %v974_v56 = vadd.f32 %v973_v55, %v972_v53  ;;  %v3086_v53 = vpack.c.bf16 %v170_v52, %v169_v38  ;;  %v2569_v55 = vld [vmem:[%s3986_s13] ss:$0 sm:$0xff] }
 0x635   :  { %v975_v57 = vrot.slane %v974_v56, 1 }
 0x637   :  { %v976_v41 = vadd.f32 %v975_v57, %v974_v56 }
 0x639   :  { %2854 = vmatmul.mubr.msk.f32.vlgmr.msra.gmra.mrb[8].mxu0 %vm172_vm0, %v976_v41 }
 0x63a   :  { %3077 = vmatpush3.bf16.msra.mxu0 %v3074_v40 }
 0x640   :  { %v1077_v58 = vpop.xlane.xlu0 %1076 }
 0x641   :  { %v1081_v62 = vmul.f32 0.03125, %v1077_v58 }
 0x643   :  { %v1083_v0 = vadd.f32 1e-05, %v1081_v62 }
 0x645   :  { %3189 = vrsqrt.f32 %v1083_v0 }
 0x64f   :  { %v3190_v3 = vpop.eup %3189 }
 0x650   :  { %v1087_v4 = vmul.f32 %v3190_v3, %v1071_v42  ;;  %v165_v42 = vld [vmem:[%s3987_s14 + $0x10] sm:$0xff] }
 0x651   :  { %v3078_v46 = vpack.c.bf16 %v166_v45, %v165_v42 }
 0x652   :  { %v1095_v7 = vmul.f32 %v2567_v5, %v1087_v4 }
 0x653   :  { %3079 = vmatprep.subr.bf16.mxu0 %v3078_v46 }
 0x654   :  { %v1103_v9 = vadd.f32 %v2568_v6, %v1095_v7  ;;  %3081 = vmatpush3.bf16.msra.mxu0 %v3078_v46  ;;  %v3328_v46 = vmov -1.0  }
 0x655   :  { %3083 = vmatprep.subr.bf16.mxu0 %v3082_v50 }
 0x656   :  { %2864 = vmatprep.mubr.msk.f32.mxu1 %vm172_vm0, %v1103_v9 }
 0x658   :  { %3085 = vmatpush3.bf16.msra.mxu0 %v3082_v50 }
 0x659   :  { %3087 = vmatprep.subr.bf16.mxu0 %v3086_v53 }
 0x65c   :  { %3089 = vmatpush3.bf16.msra.mxu0 %v3086_v53 }
 0x65d   :  { %3106 = vmatprep.subr.bf16.mxu0 %v3324_v17 }
 0x70c   :  { %v1046_v11 = vpop.f32.mrb[8].mxu0 }
 0x70d   :  { %v1047_v12 = vadd.f32 %v1046_v11, %v3636_v1  ;;  %v2855_v14 = vpop.f32.mrb[9].mxu0 }
 0x70f   :  { %v1052_v15 = vadd.f32 %v1047_v12, %v3538_v48 }
 0x711   :  { %v1060_v16 = vrot.slane %v1052_v15, %v3577_v63 }
 0x713   :  { %v3690_v43 = vsel %vm1051_vm9, %v1060_v16, %v231_v19 }
 0x714   :  { %v1066_v20 = vsel %vm172_vm0, %v3690_v43, 0.0 }
 0x715   :  { %1067 = vadd.xlane.f32.xlu1 %v1066_v20 }
 0x7a2   :  { %v1068_v1 = vpop.xlane.xlu1 %1067 }
 0x7a3   :  { %v1070_v21 = vmul.f32 0.03125, %v1068_v1 }
 0x7a5   :  { %v1072_v44 = vsub.f32 %v3690_v43, %v1070_v21 }
 0x7a7   :  { %v1074_v23 = vmul.f32 %v1072_v44, %v1072_v44 }
 0x7a9   :  { %v1078_v48 = vsel %vm172_vm0, %v1074_v23, 0.0 }
 0x7aa   :  { %1079 = vadd.xlane.f32.xlu1 %v1078_v48 }
 0x837   :  { %v1080_v31 = vpop.xlane.xlu1 %1079 }
 0x838   :  { %v1082_v32 = vmul.f32 0.03125, %v1080_v31 }
 0x83a   :  { %v1084_v33 = vadd.f32 1e-05, %v1082_v32 }
 0x83c   :  { %3191 = vrsqrt.f32 %v1084_v33 }
 0x846   :  { %v3192_v34 = vpop.eup %3191 }
 0x847   :  { %v1088_v35 = vmul.f32 %v3192_v34, %v1072_v44 }
 0x849   :  { %v1096_v36 = vmul.f32 %v2567_v5, %v1088_v35 }
 0x84b   :  { %v1104_v18 = vadd.f32 %v2568_v6, %v1096_v36 }
 0x84d   :  { %2865 = vmatmul.mubr.msk.f32.vlgmr.msra.gmra.mrb[10].mxu1 %vm172_vm0, %v1104_v18 }
 0x920   :  { %v2866_v56 = vpop.f32.mrb[10].mxu1 }
 0x921   :  { %v1189_v57 = vadd.f32 %v2866_v56, %v2569_v55  ;;  %v1183_v41 = vpop.f32.mrb[11].mxu1 }
 0x922   :  { %v1184_v58 = vadd.f32 %v2569_v55, %v1183_v41 }
 0x923   :  { %v1195_v62 = vmul.f32 0.70710677, %v1189_v57  ;;  %v1193_v41 = vmul.f32 0.5, %v1189_v57 }
 0x924   :  { %v1194_v0 = vmul.f32 0.70710677, %v1184_v58  ;;  %v1192_v55 = vmul.f32 0.5, %v1184_v58 }
 0x925   :  { %v1201_v3 = vand.u32 2147483647, %v1195_v62  ;;  %vm1197_vm10 = vcmp.ge.f32.partialorder %v1195_v62, 0.0  ;;  %v2572_v62 = vld [vmem:[%s3988_s15] ss:$0 sm:$0xff] }
 0x926   :  { %v1200_v5 = vand.u32 2147483647, %v1194_v0  ;;  %vm1196_vm11 = vcmp.ge.f32.partialorder %v1194_v0, 0.0  ;;  %v1199_v47 = vsel %vm1197_vm10, 1.0, %v3328_v46 }
 0x927   :  { %v1203_v4 = vmul.f32 0.3275911, %v1201_v3  ;;  %v1229_v11 = vsub.f32 0.0, %v1201_v3  ;;  %v1198_v38 = vsel %vm1196_vm11, 1.0, %v3328_v46 }
 0x928   :  { %v1202_v6 = vmul.f32 0.3275911, %v1200_v5  ;;  %v1228_v12 = vsub.f32 0.0, %v1200_v5 }
 0x929   :  { %v1205_v7 = vadd.f32 1.0, %v1203_v4  ;;  %v1231_v39 = vmul.f32 %v1229_v11, %v1201_v3 }
 0x92a   :  { %v1204_v9 = vadd.f32 1.0, %v1202_v6  ;;  %v1230_v19 = vmul.f32 %v1228_v12, %v1200_v5 }
 0x92b   :  { %3193 = vrcp.f32 %v1205_v7  ;;  %v1234_v21 = vmul.f32 1.442695, %v1231_v39 }
 0x92c   :  { %3195 = vrcp.f32 %v1204_v9  ;;  %v1232_v48 = vmul.f32 1.442695, %v1230_v19 }
 0x92d   :  { %3197 = vpow2.f32 %v1234_v21 }
 0x92e   :  { %3199 = vpow2.f32 %v1232_v48  ;;  %v2577_v48 = vld [vmem:[%s3976_s3 + $0x20] sm:$0xff] }
 0x935   :  { %v3194_v14 = vpop.eup %3193 }
 0x936   :  { %v3196_v15 = vpop.eup %3195  ;;  %v1211_v16 = vmul.f32 1.0614054, %v3194_v14 }
 0x937   :  { %v1210_v20 = vmul.f32 1.0614054, %v3196_v15  ;;  %v3198_v18 = vpop.eup %3197 }
 0x938   :  { %v1213_v1 = vadd.f32 -1.4531521, %v1211_v16  ;;  %v3200_v26 = vpop.eup %3199 }
 0x939   :  { %v1212_v44 = vadd.f32 -1.4531521, %v1210_v20 }
 0x93a   :  { %v1215_v23 = vmul.f32 %v3194_v14, %v1213_v1 }
 0x93b   :  { %v1214_v24 = vmul.f32 %v3196_v15, %v1212_v44  ;;  %v2582_v44 = vld [vmem:[%s3977_s4 + $0x28] sm:$0xff] }
 0x93c   :  { %v1217_v25 = vadd.f32 1.4214138, %v1215_v23 }
 0x93d   :  { %v1216_v27 = vadd.f32 1.4214138, %v1214_v24  ;;  %v2578_v24 = vld [vmem:[%s3976_s3 + $0x28] sm:$0xff] }
 0x93e   :  { %v1219_v28 = vmul.f32 %v3194_v14, %v1217_v25  ;;  %v3752_v25 = vpack.c.bf16 %v2578_v24, %v2577_v48 }
 0x93f   :  { %v1218_v29 = vmul.f32 %v3196_v15, %v1216_v27  ;;  %v2583_v27 = vld [vmem:[%s3977_s4 + $0x30] sm:$0xff] }
 0x940   :  { %v1221_v30 = vadd.f32 -0.28449672, %v1219_v28  ;;  %v2584_v28 = vld [vmem:[%s3977_s4 + $0x38] sm:$0xff] }
 0x941   :  { %v1220_v31 = vadd.f32 -0.28449672, %v1218_v29  ;;  %v2579_v29 = vld [vmem:[%s3976_s3 + $0x30] sm:$0xff] }
 0x942   :  { %v1223_v32 = vmul.f32 %v3194_v14, %v1221_v30  ;;  %v3094_v30 = vpack.c.bf16 %v2584_v28, %v2583_v27 }
 0x943   :  { %v1222_v33 = vmul.f32 %v3196_v15, %v1220_v31  ;;  %v2580_v31 = vld [vmem:[%s3976_s3 + $0x38] sm:$0xff] }
 0x944   :  { %v1225_v34 = vadd.f32 0.2548296, %v1223_v32  ;;  %v3768_v32 = vpack.c.bf16 %v2580_v31, %v2579_v29 }
 0x945   :  { %v1224_v35 = vadd.f32 0.2548296, %v1222_v33  ;;  %v2585_v33 = vld [vmem:[%s3978_s5 + $0x20] sm:$0xff] }
 0x946   :  { %v1227_v36 = vmul.f32 %v3194_v14, %v1225_v34  ;;  %v2586_v34 = vld [vmem:[%s3978_s5 + $0x28] sm:$0xff] }
 0x947   :  { %v1226_v37 = vmul.f32 %v3196_v15, %v1224_v35  ;;  %v3098_v35 = vpack.c.bf16 %v2586_v34, %v2585_v33 }
 0x948   :  { %v1237_v40 = vmul.f32 %v3198_v18, %v1227_v36 }
 0x949   :  { %v1236_v42 = vmul.f32 %v3200_v26, %v1226_v37 }
 0x94a   :  { %v1239_v45 = vsub.f32 1.0, %v1237_v40 }
 0x94b   :  { %v1238_v49 = vsub.f32 1.0, %v1236_v42 }
 0x94c   :  { %v1241_v50 = vmul.f32 %v1239_v45, %v1199_v47  ;;  %v2602_v47 = vld [vmem:[%s3974_s1 + $0x1] ss:$0 sm:$0xff]  ;;  %s2523_s1 = sshll.u32 %s3329_s22, 4  ;;  %s2524_s1 = int_to_ptr.vmem [resolvable:$true] %s2523_s1 }
 0x94d   :  { %v1240_v52 = vmul.f32 %v1238_v49, %v1198_v38  ;;  %p3296_p11 = scmp.lt.s32.totalorder %s2524_s1, %s2524_s1 }
 0x94e   :  { %v1243_v53 = vadd.f32 1.0, %v1241_v50 }
 0x94f   :  { %v1242_v56 = vadd.f32 1.0, %v1240_v52  ;;  %v2603_v52 = vld [vmem:[%s3975_s2 + $0x1] ss:$0 sm:$0xff]  ;;  %s3291_s2 = scalar_lea.vmem %s2524_s1, 256 }
 0x950   :  { %v1245_v5 = vmul.f32 %v1243_v53, %v1193_v41  ;;  %v2588_v41 = vld [vmem:[%s3978_s5 + $0x38] sm:$0xff]  ;;  %p3292_p10 = scmp.ne.s32.totalorder %s2524_s1, %s3291_s2  ;;  %p3297_p12 = scmp.lt.s32.totalorder %s3291_s2, %s3291_s2 }
 0x951   :  { %v1244_v3 = vmul.f32 %v1242_v56, %v1192_v55  ;;  %v2587_v56 = vld [vmem:[%s3978_s5 + $0x30] sm:$0xff] }
 0x952   :  { %p3298_p13 = por %p3297_p12, %p3296_p11 }
 0x953   :  { %2883 = vmatprep.mubr.msk.f32.mxu0 %vm1252_vm12, %v1244_v3 }
 0x954   :  { %2884 = vmatmul.mubr.msk.f32.vlgmr.msra.gmra.mrb[10].mxu0 %vm1252_vm12, %v1245_v5  ;;  %p3299_p0 = pnand %p3298_p13, %p3292_p10 }
 0x955   :  { %2916 = vmatprep.mubr.msk.f32.mxu0 %vm3325_vm1, %v3326_v22  ;;  %3108 = vmatpush3.bf16.msra.mxu0 %v3752_v25 }
 0x956   :  { %3109 = vmatprep.subr.bf16.mxu0 %v3324_v17 }
 0x959   :  { %3111 = vmatpush3.bf16.msra.mxu0 %v3768_v32 }
 0x95a   :  { %2930 = vmatprep.subr.mxu0 %v3326_v22 }
 0xa27   :  { %v2885_v0 = vpop.f32.mrb[10].mxu0 }
 0xa28   :  { %v1331_v4 = vadd.f32 %v2885_v0, %v2572_v62  ;;  %v1325_v6 = vpop.f32.mrb[11].mxu0 }
 0xa29   :  { %v1326_v58 = vadd.f32 %v2572_v62, %v1325_v6  ;;  %v3102_v62 = vpack.c.bf16 %v2588_v41, %v2587_v56 }
 0xa2a   :  { %v1335_v57 = vadd.f32 %v1331_v4, %v3690_v43 }
 0xa2b   :  { %v1334_v7 = vadd.f32 %v1326_v58, %v3657_v13  ;;  %v2581_v13 = vld [vmem:[%s3977_s4 + $0x20] sm:$0xff] }
 0xa2c   :  { %v1387_v9 = vsel %vm172_vm0, %v1335_v57, 0.0  ;;  %v3090_v23 = vpack.c.bf16 %v2582_v44, %v2581_v13 }
 0xa2d   :  { %1388 = vadd.xlane.f32.xlu1 %v1387_v9  ;;  %v1384_v11 = vsel %vm172_vm0, %v1334_v7, 0.0 }
 0xa2e   :  { %1385 = vadd.xlane.f32.xlu0 %v1384_v11  ;;  %3091 = vmatprep.subr.bf16.mxu1 %v3090_v23 }
 0xa2f   :  { %3093 = vmatpush3.bf16.msra.mxu1 %v3090_v23 }
 0xa30   :  { %3095 = vmatprep.subr.bf16.mxu1 %v3094_v30 }
 0xa33   :  { %3097 = vmatpush3.bf16.msra.mxu1 %v3094_v30 }
 0xa34   :  { %3099 = vmatprep.subr.bf16.mxu1 %v3098_v35 }
 0xaba   :  { %v1389_v12 = vpop.xlane.xlu1 %1388 }
 0xabb   :  { %v1391_v14 = vmul.f32 0.03125, %v1389_v12  ;;  %v1386_v39 = vpop.xlane.xlu0 %1385 }
 0xabc   :  { %v1390_v15 = vmul.f32 0.03125, %v1386_v39 }
 0xabd   :  { %v1393_v16 = vsub.f32 %v1335_v57, %v1391_v14 }
 0xabe   :  { %v1392_v19 = vsub.f32 %v1334_v7, %v1390_v15 }
 0xabf   :  { %v1395_v20 = vmul.f32 %v1393_v16, %v1393_v16 }
 0xac0   :  { %v1394_v1 = vmul.f32 %v1392_v19, %v1392_v19 }
 0xac1   :  { %v1399_v21 = vsel %vm172_vm0, %v1395_v20, 0.0 }
 0xac2   :  { %1400 = vadd.xlane.f32.xlu1 %v1399_v21  ;;  %v1396_v43 = vsel %vm172_vm0, %v1394_v1, 0.0 }
 0xac3   :  { %1397 = vadd.xlane.f32.xlu0 %v1396_v43 }
 0xb4f   :  { %v1401_v36 = vpop.xlane.xlu1 %1400 }
 0xb50   :  { %v1403_v18 = vmul.f32 0.03125, %v1401_v36  ;;  %v1398_v37 = vpop.xlane.xlu0 %1397 }
 0xb51   :  { %v1402_v26 = vmul.f32 0.03125, %v1398_v37 }
 0xb52   :  { %v1405_v40 = vadd.f32 1e-05, %v1403_v18  ;;  %v1359_v18 = vld [vmem:[#allocation5 + $0x38] sm:$0xff] }
 0xb53   :  { %v1404_v42 = vadd.f32 1e-05, %v1402_v26 }
 0xb54   :  { %3201 = vrsqrt.f32 %v1405_v40 }
 0xb55   :  { %3203 = vrsqrt.f32 %v1404_v42 }
 0xb5e   :  { %v3202_v45 = vpop.eup %3201 }
 0xb5f   :  { %v3204_v49 = vpop.eup %3203  ;;  %v3781_v50 = vmul.f32 %v3202_v45, %v1393_v16 }
 0xb60   :  { %v3783_v38 = vmul.f32 %v3204_v49, %v1392_v19 }
 0xb61   :  { %v1417_v53 = vmul.f32 %v2602_v47, %v3781_v50 }
 0xb62   :  { %v1416_v55 = vmul.f32 %v2602_v47, %v3783_v38 }
 0xb63   :  { %v3798_v5 = vadd.f32 %v2603_v52, %v1417_v53 }
 0xb64   :  { %v3796_v3 = vadd.f32 %v2603_v52, %v1416_v55 }
 0xb66   :  { %2894 = vmatprep.mubr.msk.f32.mxu1 %vm172_vm0, %v3796_v3  ;;  %2917 = vmatmul.mubr.msk.f32.vlgmr.msra.gmra.mrb[12].mxu0 %vm172_vm0, %v3796_v3 }
 0xb67   :  { %2895 = vmatmul.mubr.msk.f32.vlgmr.msra.gmra.mrb[12].mxu1 %vm172_vm0, %v3798_v5  ;;  %2931 = vmatpush3.msk.msra.mxu0 %vm560_vm4, %v3590_v10 }
 0xb68   :  { %3101 = vmatpush3.bf16.msra.mxu1 %v3098_v35  ;;  %2905 = vmatprep.mubr.msk.f32.mxu1 %vm172_vm0, %v3796_v3  ;;  %v1357_v35 = vld [vmem:[#allocation5 + $0x28] sm:$0xff] }
 0xb69   :  { %3103 = vmatprep.subr.bf16.mxu1 %v3102_v62  ;;  %2932 = vmatprep.mubr.msk.f32.mxu0 %vm3325_vm1, %v3326_v22 }
 0xb6a   :  { %3124 = vmatprep.subr.bf16.mxu0 %v3324_v17 }
 0xb6c   :  { %3105 = vmatpush3.bf16.msra.mxu1 %v3102_v62 }
 0xb6d   :  { %3112 = vmatprep.subr.bf16.mxu1 %v3324_v17 }
 0xb6f   :  { %2906 = vmatmul.mubr.msk.f32.vlgmr.msra.gmra.mrb[14].mxu1 %vm172_vm0, %v3798_v5 }
 0xb70   :  { %3114 = vmatpush3.bf16.msk.msra.mxu1 %vm3560_vm8, %v3327_v60  ;;  %2927 = vmatprep.mubr.msk.f32.mxu1 %vm3325_vm1, %v3326_v22 }
 0xb71   :  { %3115 = vmatprep.subr.bf16.mxu1 %v3324_v17 }
 0xb74   :  { %3117 = vmatpush3.bf16.msk.msra.mxu1 %vm3568_vm15, %v3327_v60 }
 0xb75   :  { %3118 = vmatprep.subr.bf16.mxu1 %v3324_v17 }
 0xc39   :  { %v1652_v0 = vpop.f32.mrb[12].mxu0 }
 0xc3a   :  { %v1659_v4 = vrot.slane %v1652_v0, %v3577_v63  ;;  %v3827_v6 = vpop.f32.mrb[12].mxu1  ;;  %v2918_v58 = vpop.f32.mrb[13].mxu0 }
 0xc3b   :  { %v1502_v57 = vpop.f32.mrb[13].mxu1 }
 0xc3c   :  { %v1660_v7 = vmul.f32 %v1659_v4, %v1502_v57  ;;  %v3872_v4 = vld [vmem:[%s3980_s7 + $0x1] sm:$0x1]  ;;  %v1426_v57 = vmul.f32 %v3641_v2, %v3783_v38 }
 0xc3e   :  { %2928 = vmatmul.mubr.msk.f32.vlgmr.msra.gmra.mrb[16].mxu1 %vm172_vm0, %v1660_v7 }
 0xc3f   :  { %2943 = vmatprep.mubr.msk.f32.mxu1 %vm3325_vm1, %v3326_v22 }
 0xc42   :  { %v3832_v9 = vpop.f32.mrb[14].mxu1 }
 0xc43   :  { %v1577_v11 = vpop.f32.mrb[15].mxu1 }
 0xd11   :  { %v1730_v12 = vpop.f32.mrb[16].mxu1 }
 0xd12   :  { %v1734_v14 = vmul.f32 0.35355338, %v1730_v12  ;;  %v2929_v39 = vpop.f32.mrb[17].mxu1 }
 0xd14   :  { %v1735_v15 = vsel %vm537_vm6, %v1734_v14, -inf }
 0xd15   :  { %v1736_v16 = vrot.slane %v1735_v15, 4 }
 0xd17   :  { %v1737_v19 = vmax.f32 %v1735_v15, %v1736_v16 }
 0xd19   :  { %v1738_v20 = vrot.slane %v1737_v19, 2 }
 0xd1b   :  { %v1739_v1 = vmax.f32 %v1737_v19, %v1738_v20 }
 0xd1d   :  { %v1740_v21 = vrot.slane %v1739_v1, 1 }
 0xd1f   :  { %v1741_v43 = vmax.f32 %v1739_v1, %v1740_v21 }
 0xd21   :  { %v1742_v13 = vsub.f32 %v1734_v14, %v1741_v43 }
 0xd23   :  { %v1743_v44 = vmul.f32 1.442695, %v1742_v13 }
 0xd25   :  { %3205 = vpow2.f32 %v1743_v44 }
 0xd2f   :  { %v3206_v23 = vpop.eup %3205 }
 0xd30   :  { %v1745_v48 = vsel %vm537_vm6, %v3206_v23, 0.0 }
 0xd31   :  { %v1746_v24 = vrot.slane %v1745_v48, 4 }
 0xd33   :  { %v1747_v27 = vadd.f32 %v1746_v24, %v1745_v48 }
 0xd35   :  { %v1748_v28 = vrot.slane %v1747_v27, 2 }
 0xd37   :  { %v1749_v29 = vadd.f32 %v1748_v28, %v1747_v27 }
 0xd39   :  { %v1750_v30 = vrot.slane %v1749_v29, 1 }
 0xd3b   :  { %v1751_v31 = vadd.f32 %v1750_v30, %v1749_v29 }
 0xd3d   :  { %3207 = vrcp.f32 %v1751_v31 }
 0xd47   :  { %v3208_v33 = vpop.eup %3207 }
 0xd48   :  { %v1753_v34 = vmul.f32 %v3208_v33, %v3206_v23 }
 0xd4a   :  { %2933 = vmatmul.mubr.msk.f32.vlgmr.msra.gmra.mrb[14].mxu0 %vm537_vm6, %v1753_v34 }
 0xd4b   :  { %3126 = vmatpush3.bf16.msra.mxu0 %v3752_v25  ;;  %2954 = vmatprep.mubr.msk.f32.mxu0 %vm3325_vm1, %v3326_v22  ;;  %v1356_v25 = vld [vmem:[#allocation5 + $0x20] sm:$0xff] }
 0xd4c   :  { %3127 = vmatprep.subr.bf16.mxu0 %v3324_v17  ;;  %v3850_v36 = vpack.c.bf16 %v1357_v35, %v1356_v25 }
 0xd4e   :  { %3120 = vmatpush3.bf16.msra.mxu1 %v3850_v36 }
 0xd4f   :  { %3129 = vmatpush3.bf16.msra.mxu0 %v3768_v32  ;;  %3121 = vmatprep.subr.bf16.mxu1 %v3324_v17  ;;  %v1358_v32 = vld [vmem:[#allocation5 + $0x30] sm:$0xff] }
 0xd50   :  { %2968 = vmatprep.subr.mxu0 %v3326_v22  ;;  %v3122_v37 = vpack.c.bf16 %v1359_v18, %v1358_v32 }
 0xd52   :  { %2955 = vmatmul.mubr.msk.f32.vlgmr.msra.gmra.mrb[16].mxu0 %vm172_vm0, %v3798_v5  ;;  %3123 = vmatpush3.bf16.msra.mxu1 %v3122_v37 }
 0xd53   :  { %2969 = vmatpush3.msk.msra.mxu0 %vm560_vm4, %v3590_v10  ;;  %2970 = vmatprep.mubr.msk.f32.mxu0 %vm3325_vm1, %v3326_v22 }
 0xd54   :  { %3136 = vmatprep.subr.bf16.mxu0 %v3324_v17  ;;  %3130 = vmatprep.subr.bf16.mxu1 %v3324_v17 }
 0xe1d   :  { %v1823_v10 = vpop.f32.mrb[14].mxu0 }
 0xe1e   :  { %v1827_v26 = vmul.f32 %v1823_v10, %v1577_v11  ;;  %v2934_v40 = vpop.f32.mrb[15].mxu0 }
 0xe20   :  { %v1828_v42 = vsel %vm172_vm0, %v1827_v26, 0.0 }
 0xe21   :  { %v1829_v45 = vrot.slane %v1828_v42, 4 }
 0xe23   :  { %v1830_v47 = vadd.f32 %v1829_v45, %v1828_v42 }
 0xe25   :  { %v1831_v49 = vrot.slane %v1830_v47, 2  ;;  %v1981_v52 = vpop.f32.mrb[16].mxu0 }
 0xe26   :  { %v1988_v53 = vrot.slane %v1981_v52, %v3577_v63  ;;  %v2956_v55 = vpop.f32.mrb[17].mxu0 }
 0xe27   :  { %v1832_v56 = vadd.f32 %v1831_v49, %v1830_v47 }
 0xe28   :  { %v1989_v41 = vmul.f32 %v3827_v6, %v1988_v53 }
 0xe29   :  { %v1833_v62 = vrot.slane %v1832_v56, 1 }
 0xe2b   :  { %v1834_v0 = vadd.f32 %v1833_v62, %v1832_v56  ;;  %v2627_v56 = vld [vmem:[%s3984_s11 + $0x1] ss:$0 sm:$0xff] }
 0xe2d   :  { %2944 = vmatmul.mubr.msk.f32.vlgmr.msra.gmra.mrb[18].mxu1 %vm172_vm0, %v1834_v0 }
 0xe2e   :  { %3132 = vmatpush3.bf16.msk.msra.mxu1 %vm3560_vm8, %v3327_v60  ;;  %2965 = vmatprep.mubr.msk.f32.mxu1 %vm3325_vm1, %v3326_v22 }
 0xe2f   :  { %3133 = vmatprep.subr.bf16.mxu1 %v3324_v17 }
 0xe32   :  { %3135 = vmatpush3.bf16.msk.msra.mxu1 %vm3568_vm15, %v3327_v60  ;;  %v1428_v60 = vadd.f32 %v3649_v8, %v1426_v57 }
 0xe35   :  { %2966 = vmatmul.mubr.msk.f32.vlgmr.msra.gmra.mrb[20].mxu1 %vm172_vm0, %v1989_v41 }
 0xf00   :  { %v1904_v6 = vpop.f32.mrb[18].mxu1 }
 0xf01   :  { %v1905_v59 = vadd.f32 %v3872_v4, %v1904_v6  ;;  %v2945_v58 = vpop.f32.mrb[19].mxu1 }
 0xf02   :  { %v1427_v58 = vmul.f32 %v3641_v2, %v3781_v50  ;;  %v1367_v50 = vld [vmem:[#allocation7 + $0x20] sm:$0xff] }
 0xf03   :  { %v1908_v7 = vadd.f32 %v1905_v59, %v3796_v3 }
 0xf05   :  { %v1912_v11 = vrot.slane %v1908_v7, %v3577_v63 }
 0xf07   :  { %v3882_v61 = vsel %vm715_vm7, %v1912_v11, %v1428_v60  ;;  %v1429_v11 = vadd.f32 %v3649_v8, %v1427_v58  ;;  %v1370_v8 = vld [vmem:[#allocation7 + $0x38] sm:$0xff] }
 0xf08   :  { %v2059_v12 = vpop.f32.mrb[20].mxu1  ;;  %v2244_v14 = vsel %vm172_vm0, %v3882_v61, 0.0 }
 0xf09   :  { %v2063_v39 = vmul.f32 0.35355338, %v2059_v12  ;;  %v2967_v15 = vpop.f32.mrb[21].mxu1  ;;  %2245 = vadd.xlane.f32.xlu0 %v2244_v14 }
 0xf0b   :  { %v2064_v16 = vsel %vm537_vm6, %v2063_v39, -inf }
 0xf0c   :  { %v2065_v38 = vrot.slane %v2064_v16, 4 }
 0xf0e   :  { %v2066_v19 = vmax.f32 %v2064_v16, %v2065_v38  ;;  %v3146_v16 = vpack.c.bf16 %v1370_v8, %v1369_v54 }
 0xf10   :  { %v2067_v3 = vrot.slane %v2066_v19, 2 }
 0xf12   :  { %v2068_v20 = vmax.f32 %v2066_v19, %v2067_v3 }
 0xf14   :  { %v2069_v1 = vrot.slane %v2068_v20, 1 }
 0xf16   :  { %v2070_v21 = vmax.f32 %v2068_v20, %v2069_v1 }
 0xf18   :  { %v2071_v43 = vsub.f32 %v2063_v39, %v2070_v21 }
 0xf1a   :  { %v2072_v13 = vmul.f32 1.442695, %v2071_v43 }
 0xf1c   :  { %3209 = vpow2.f32 %v2072_v13  ;;  %v2593_v13 = vld [vmem:[%s3987_s14 + $0x40] sm:$0xff] }
 0xf26   :  { %v3210_v51 = vpop.eup %3209 }
 0xf27   :  { %v2074_v44 = vsel %vm537_vm6, %v3210_v51, 0.0 }
 0xf28   :  { %v2075_v23 = vrot.slane %v2074_v44, 4 }
 0xf2a   :  { %v2076_v48 = vadd.f32 %v2075_v23, %v2074_v44  ;;  %v2595_v23 = vld [vmem:[%s3987_s14 + $0x50] sm:$0xff] }
 0xf2c   :  { %v2077_v24 = vrot.slane %v2076_v48, 2 }
 0xf2e   :  { %v2078_v27 = vadd.f32 %v2077_v24, %v2076_v48  ;;  %v2596_v48 = vld [vmem:[%s3987_s14 + $0x58] sm:$0xff] }
 0xf2f   :  { %v3154_v24 = vpack.c.bf16 %v2596_v48, %v2595_v23 }
 0xf30   :  { %v2079_v28 = vrot.slane %v2078_v27, 1 }
 0xf32   :  { %v2080_v29 = vadd.f32 %v2079_v28, %v2078_v27  ;;  %v2597_v27 = vld [vmem:[%s3987_s14 + $0x60] sm:$0xff]  ;;  %v2598_v28 = vld [vmem:[%s3987_s14 + $0x68] sm:$0xff] }
 0xf34   :  { %3211 = vrcp.f32 %v2080_v29  ;;  %v3158_v29 = vpack.c.bf16 %v2598_v28, %v2597_v27  ;;  %v2631_v27 = vld [vmem:[%s3988_s15 + $0x1] ss:$0 sm:$0xff] }
 0xf3e   :  { %v3212_v30 = vpop.eup %3211 }
 0xf3f   :  { %v2082_v31 = vmul.f32 %v3212_v30, %v3210_v51  ;;  %v2594_v51 = vld [vmem:[%s3987_s14 + $0x48] sm:$0xff]  ;;  %v2599_v30 = vld [vmem:[%s3987_s14 + $0x70] sm:$0xff] }
 0xf40   :  { %v3150_v44 = vpack.c.bf16 %v2594_v51, %v2593_v13 }
 0xf41   :  { %2971 = vmatmul.mubr.msk.f32.vlgmr.msra.gmra.mrb[18].mxu0 %vm537_vm6, %v2082_v31  ;;  %v2600_v31 = vld [vmem:[%s3987_s14 + $0x78] sm:$0xff] }
 0xf42   :  { %3138 = vmatpush3.bf16.msra.mxu0 %v3850_v36  ;;  %2981 = vmatprep.mubr.msk.f32.mxu0 %vm3325_vm1, %v3326_v22 }
 0xf43   :  { %3139 = vmatprep.subr.bf16.mxu0 %v3324_v17 }
 0xf46   :  { %3141 = vmatpush3.bf16.msra.mxu0 %v3122_v37 }
 0xf47   :  { %3151 = vmatprep.subr.bf16.mxu0 %v3150_v44 }
 0xf96   :  { %v2246_v33 = vpop.xlane.xlu0 %2245 }
 0xf97   :  { %v2250_v34 = vmul.f32 0.03125, %v2246_v33  ;;  %v3162_v33 = vpack.c.bf16 %v2600_v31, %v2599_v30 }
 0xf99   :  { %v2252_v25 = vsub.f32 %v3882_v61, %v2250_v34  ;;  %v2628_v34 = vld [vmem:[%s3986_s13 + $0x1] ss:$0 sm:$0xff] }
 0xf9b   :  { %v2254_v35 = vmul.f32 %v2252_v25, %v2252_v25 }
 0xf9d   :  { %v2256_v32 = vsel %vm172_vm0, %v2254_v35, 0.0 }
 0xf9e   :  { %2257 = vadd.xlane.f32.xlu0 %v2256_v32 }
0x1014   :  { %v2152_v18 = vpop.f32.mrb[18].mxu0 }
0x1015   :  { %v2156_v10 = vmul.f32 %v3832_v9, %v2152_v18  ;;  %v2972_v26 = vpop.f32.mrb[19].mxu0  ;;  %v2626_v9 = vld [vmem:[%s3983_s10 + $0x1] ss:$0 sm:$0xff] }
0x1017   :  { %v2157_v36 = vsel %vm172_vm0, %v2156_v10, 0.0 }
0x1018   :  { %v2158_v40 = vrot.slane %v2157_v36, 4 }
0x101a   :  { %v2159_v42 = vadd.f32 %v2158_v40, %v2157_v36 }
0x101c   :  { %v2160_v22 = vrot.slane %v2159_v42, 2 }
0x101e   :  { %v2161_v45 = vadd.f32 %v2160_v22, %v2159_v42 }
0x1020   :  { %v2162_v17 = vrot.slane %v2161_v45, 1 }
0x1022   :  { %v2163_v37 = vadd.f32 %v2162_v17, %v2161_v45 }
0x1024   :  { %2982 = vmatmul.mubr.msk.f32.vlgmr.msra.gmra.mrb[20].mxu0 %vm172_vm0, %v2163_v37 }
0x1025   :  { %3153 = vmatpush3.bf16.msra.mxu0 %v3150_v44 }
0x1026   :  { %3155 = vmatprep.subr.bf16.mxu0 %v3154_v24 }
0x1029   :  { %3157 = vmatpush3.bf16.msra.mxu0 %v3154_v24 }
0x102a   :  { %3159 = vmatprep.subr.bf16.mxu0 %v3158_v29 }
0x102b   :  { %v2258_v47 = vpop.xlane.xlu0 %2257 }
0x102c   :  { %v2262_v49 = vmul.f32 0.03125, %v2258_v47 }
0x102d   :  { %3161 = vmatpush3.bf16.msra.mxu0 %v3158_v29 }
0x102e   :  { %v2264_v52 = vadd.f32 1e-05, %v2262_v49  ;;  %3163 = vmatprep.subr.bf16.mxu0 %v3162_v33 }
0x1030   :  { %3213 = vrsqrt.f32 %v2264_v52 }
0x1031   :  { %3165 = vmatpush3.bf16.msra.mxu0 %v3162_v33 }
0x103a   :  { %v3214_v53 = vpop.eup %3213 }
0x103b   :  { %v2268_v55 = vmul.f32 %v3214_v53, %v2252_v25 }
0x103d   :  { %v2276_v41 = vmul.f32 %v2626_v9, %v2268_v55 }
0x103f   :  { %v2284_v62 = vadd.f32 %v2627_v56, %v2276_v41 }
0x1041   :  { %2992 = vmatprep.mubr.msk.f32.mxu1 %vm172_vm0, %v2284_v62 }
0x10f7   :  { %v2233_v0 = vpop.f32.mrb[20].mxu0 }
0x10f8   :  { %v2234_v6 = vadd.f32 %v3872_v4, %v2233_v0  ;;  %v2983_v59 = vpop.f32.mrb[21].mxu0 }
0x10fa   :  { %v2237_v57 = vadd.f32 %v2234_v6, %v3798_v5 }
0x10fc   :  { %v2241_v7 = vrot.slane %v2237_v57, %v3577_v63  ;;  %v1368_v63 = vld [vmem:[#allocation7 + $0x28] sm:$0xff] }
0x10fd   :  { %v3142_v5 = vpack.c.bf16 %v1368_v63, %v1367_v50 }
0x10fe   :  { %v3913_v60 = vsel %vm1051_vm9, %v2241_v7, %v1429_v11 }
0x10ff   :  { %v2247_v12 = vsel %vm172_vm0, %v3913_v60, 0.0  ;;  %3143 = vmatprep.subr.bf16.mxu1 %v3142_v5 }
0x1100   :  { %2248 = vadd.xlane.f32.xlu1 %v2247_v12  ;;  %3145 = vmatpush3.bf16.msra.mxu1 %v3142_v5 }
0x1101   :  { %3147 = vmatprep.subr.bf16.mxu1 %v3146_v16 }
0x1104   :  { %3149 = vmatpush3.bf16.msra.mxu1 %v3146_v16 }
0x118d   :  { %v2249_v14 = vpop.xlane.xlu1 %2248 }
0x118e   :  { %v2251_v4 = vmul.f32 0.03125, %v2249_v14 }
0x1190   :  { %v2253_v39 = vsub.f32 %v3913_v60, %v2251_v4 }
0x1192   :  { %v2255_v15 = vmul.f32 %v2253_v39, %v2253_v39 }
0x1194   :  { %v2259_v2 = vsel %vm172_vm0, %v2255_v15, 0.0 }
0x1195   :  { %2260 = vadd.xlane.f32.xlu1 %v2259_v2 }
0x1222   :  { %v2261_v38 = vpop.xlane.xlu1 %2260 }
0x1223   :  { %v2263_v19 = vmul.f32 0.03125, %v2261_v38 }
0x1225   :  { %v2265_v3 = vadd.f32 1e-05, %v2263_v19 }
0x1227   :  { %3215 = vrsqrt.f32 %v2265_v3 }
0x1231   :  { %v3216_v20 = vpop.eup %3215 }
0x1232   :  { %v2269_v1 = vmul.f32 %v3216_v20, %v2253_v39 }
0x1234   :  { %v2277_v21 = vmul.f32 %v2626_v9, %v2269_v1 }
0x1236   :  { %v2285_v43 = vadd.f32 %v2627_v56, %v2277_v21 }
0x1238   :  { %2993 = vmatmul.mubr.msk.f32.vlgmr.msra.gmra.mrb[22].mxu1 %vm172_vm0, %v2285_v43 }
0x130b   :  { %v2994_v25 = vpop.f32.mrb[22].mxu1 }
0x130c   :  { %v2370_v35 = vadd.f32 %v2994_v25, %v2628_v34  ;;  %v2364_v32 = vpop.f32.mrb[23].mxu1 }
0x130d   :  { %v2365_v18 = vadd.f32 %v2628_v34, %v2364_v32 }
0x130e   :  { %v2376_v10 = vmul.f32 0.70710677, %v2370_v35  ;;  %v2374_v23 = vmul.f32 0.5, %v2370_v35 }
0x130f   :  { %v2375_v26 = vmul.f32 0.70710677, %v2365_v18  ;;  %v2373_v51 = vmul.f32 0.5, %v2365_v18 }
0x1310   :  { %v2382_v36 = vand.u32 2147483647, %v2376_v10  ;;  %vm2378_vm1 = vcmp.ge.f32.partialorder %v2376_v10, 0.0 }
0x1311   :  { %v2381_v40 = vand.u32 2147483647, %v2375_v26  ;;  %vm2377_vm8 = vcmp.ge.f32.partialorder %v2375_v26, 0.0  ;;  %v2380_v3 = vsel %vm2378_vm1, 1.0, %v3328_v46 }
0x1312   :  { %v2384_v42 = vmul.f32 0.3275911, %v2382_v36  ;;  %v2410_v37 = vsub.f32 0.0, %v2382_v36  ;;  %v2379_v21 = vsel %vm2377_vm8, 1.0, %v3328_v46 }
0x1313   :  { %v2383_v22 = vmul.f32 0.3275911, %v2381_v40  ;;  %v2409_v47 = vsub.f32 0.0, %v2381_v40 }
0x1314   :  { %v2386_v45 = vadd.f32 1.0, %v2384_v42  ;;  %v2412_v52 = vmul.f32 %v2410_v37, %v2382_v36 }
0x1315   :  { %v2385_v17 = vadd.f32 1.0, %v2383_v22  ;;  %v2411_v55 = vmul.f32 %v2409_v47, %v2381_v40 }
0x1316   :  { %3217 = vrcp.f32 %v2386_v45  ;;  %v2415_v62 = vmul.f32 1.442695, %v2412_v52 }
0x1317   :  { %3219 = vrcp.f32 %v2385_v17  ;;  %v2413_v59 = vmul.f32 1.442695, %v2411_v55 }
0x1318   :  { %3221 = vpow2.f32 %v2415_v62 }
0x1319   :  { %3223 = vpow2.f32 %v2413_v59 }
0x1320   :  { %v3218_v49 = vpop.eup %3217 }
0x1321   :  { %v3220_v53 = vpop.eup %3219  ;;  %v2392_v9 = vmul.f32 1.0614054, %v3218_v49 }
0x1322   :  { %v2391_v56 = vmul.f32 1.0614054, %v3220_v53  ;;  %v3222_v5 = vpop.eup %3221 }
0x1323   :  { %v2394_v41 = vadd.f32 -1.4531521, %v2392_v9  ;;  %v3224_v8 = vpop.eup %3223 }
0x1324   :  { %v2393_v0 = vadd.f32 -1.4531521, %v2391_v56 }
0x1325   :  { %v2396_v6 = vmul.f32 %v3218_v49, %v2394_v41 }
0x1326   :  { %v2395_v58 = vmul.f32 %v3220_v53, %v2393_v0 }
0x1327   :  { %v2398_v57 = vadd.f32 1.4214138, %v2396_v6 }
0x1328   :  { %v2397_v7 = vadd.f32 1.4214138, %v2395_v58 }
0x1329   :  { %v2400_v11 = vmul.f32 %v3218_v49, %v2398_v57 }
0x132a   :  { %v2399_v12 = vmul.f32 %v3220_v53, %v2397_v7 }
0x132b   :  { %v2402_v14 = vadd.f32 -0.28449672, %v2400_v11 }
0x132c   :  { %v2401_v4 = vadd.f32 -0.28449672, %v2399_v12 }
0x132d   :  { %v2404_v39 = vmul.f32 %v3218_v49, %v2402_v14 }
0x132e   :  { %v2403_v15 = vmul.f32 %v3220_v53, %v2401_v4 }
0x132f   :  { %v2406_v2 = vadd.f32 0.2548296, %v2404_v39 }
0x1330   :  { %v2405_v50 = vadd.f32 0.2548296, %v2403_v15 }
0x1331   :  { %v2408_v63 = vmul.f32 %v3218_v49, %v2406_v2 }
0x1332   :  { %v2407_v54 = vmul.f32 %v3220_v53, %v2405_v50 }
0x1333   :  { %v2418_v16 = vmul.f32 %v3222_v5, %v2408_v63 }
0x1334   :  { %v2417_v38 = vmul.f32 %v3224_v8, %v2407_v54 }
0x1335   :  { %v2420_v19 = vsub.f32 1.0, %v2418_v16 }
0x1336   :  { %v2419_v20 = vsub.f32 1.0, %v2417_v38 }
0x1337   :  { %v2422_v1 = vmul.f32 %v2420_v19, %v2380_v3 }
0x1338   :  { %v2421_v43 = vmul.f32 %v2419_v20, %v2379_v21 }
0x1339   :  { %v2424_v13 = vadd.f32 1.0, %v2422_v1 }
0x133a   :  { %v2423_v44 = vadd.f32 1.0, %v2421_v43 }
0x133b   :  { %v2426_v24 = vmul.f32 %v2424_v13, %v2374_v23 }
0x133c   :  { %v2425_v48 = vmul.f32 %v2423_v44, %v2373_v51 }
0x133e   :  { %3011 = vmatprep.mubr.msk.f32.mxu0 %vm1252_vm12, %v2425_v48 }
0x133f   :  { %3012 = vmatmul.mubr.msk.f32.vlgmr.msra.gmra.mrb[22].mxu0 %vm1252_vm12, %v2426_v24 }
0x1412   :  { %v3013_v28 = vpop.f32.mrb[22].mxu0 }
0x1413   :  { %v2511_v29 = vadd.f32 %v3013_v28, %v2631_v27  ;;  %v2505_v30 = vpop.f32.mrb[23].mxu0 }
0x1414   :  { %v2506_v46 = vadd.f32 %v2631_v27, %v2505_v30 }
0x1415   :  { %v2515_v31 = vadd.f32 %v2511_v29, %v3913_v60 }
0x1416   :  { %v2514_v33 = vadd.f32 %v2506_v46, %v3882_v61 }
0x1417   :  { %2517 = vst.msk [vmem:[#allocation8 + $0x8] sm:$0xff] %vm172_vm0, %v2515_v31 }
0x1418   :  { %2516 = vst.msk [vmem:[#allocation8] sm:$0xff] %vm172_vm0, %v2514_v33 }
0x1419   :  { %3302 = shalt.err (!%p3299_p0)
}
0x141a   :  { %s3303_s7 = scalar_lea.hbm %s3989_s16, 256 }
0x141b   :  { %p3304_p1 = scmp.ne.s32.totalorder %s3989_s16, %s3303_s7  ;;  %p3307_p2 = scmp.lt.u32.totalorder %s3303_s7, %s3989_s16 }
0x141d   :  { %p3309_p3 = pnand %p3307_p2, %p3304_p1 }
0x141f   :  { %3312 = shalt.err (!%p3309_p3)
}
0x1420   :  { %2529 = dma.vmem_to_hbm [thread:$0]  %s2524_s1, 256, %s3989_s16, [#allocation4], %s3321_s18, %s3321_s18, %s3322_s19  }
0x1421   :  { %3317 = dma.done.wait [#allocation4], 256  }
0x1422   :  { %3318 = vsyncadd [#allocation4], 4294967040 }
0x1423   :  { %2533 = vsyncpa [#allocation3], 1 }
0x1424   :  { %2534 = vsyncpa [#allocation6], 1 }
0x1425   :  { %2535 = vsyncpa [#allocation4], 1 }

</bundles_post_ra>
